<compile_context>
chip_gen: v5e
topology: v5e:2x2
jax: 0.10.0
libtpu: 0.0.40
codegen_flags: <defaults>
</compile_context>

<pallas_src>
import functools

import jax
import jax.numpy as jnp
from jax.experimental import pallas as pl
from jax.experimental.pallas import tpu as pltpu


PARAM_ORDER = (
    "ln1_g", "ln1_b", "wq", "bq", "wk", "bk", "wv", "bv", "wo", "bo",
    "ln2_g", "ln2_b", "w1", "b1", "w2", "b2",
)
_MATMUL_WEIGHTS = ("wq", "wk", "wv", "wo", "w1", "w2")


# ---------------------------------------------------------------------------
# In-kernel helpers
# ---------------------------------------------------------------------------
def _layernorm(x, gamma, beta, eps=1e-5):
    mu = jnp.mean(x, axis=-1, keepdims=True)
    var = jnp.mean((x - mu) ** 2, axis=-1, keepdims=True)
    return (x - mu) * jax.lax.rsqrt(var + eps) * gamma + beta


# ---------------------------------------------------------------------------
# Fused decoder kernel: grid = (batch_blocks, num_layers)
#   axis 0 ("parallel"):   independent batch-row blocks (megacore friendly)
#   axis 1 ("arbitrary"):  layer index; activation stays resident in VMEM
# ---------------------------------------------------------------------------
def fused_decoder_kernel(
    x_ref, cos_ref, sin_ref, rot_ref,
    ln1_g, ln1_b, wq, bq, wk, bk, wv, bv, wo, bo,
    ln2_g, ln2_b, w1, b1, w2, b2,
    lnf_g, lnf_b,
    o_ref,
    x_scr,
    *, nhead, bb, seq_len, compute_dtype,
):
    layer = pl.program_id(1)
    n_layers = pl.num_programs(1)

    # Load the input activation into the resident accumulator on layer 0 only.
    @pl.when(layer == 0)
    def _():
        x_scr[...] = x_ref[...].astype(jnp.float32)

    x = x_scr[...]                       # (rows, D) f32, rows = bb * seq_len
    D = x.shape[-1]
    dh = D // nhead
    rows = bb * seq_len

    def cast(a):
        return a.astype(compute_dtype)

    def mm(a, w):                        # MXU matmul with f32 accumulation
        return jnp.dot(cast(a), cast(w), preferred_element_type=jnp.float32)

    # Hoisted RoPE tables (loop-invariant; JAX does not CSE broadcasts).
    cos_t = cos_ref[...]                 # (rows, dh) f32
    sin_t = sin_ref[...]                 # (rows, dh) f32

    def rope(t):
        # rotate-half as a tiny (dh, dh) +/-1 matmul on the MXU slot
        # (no lane-shuffle / concatenate on the VALU path).
        return t * cos_t + mm(t, rot_ref[0:dh, 0:dh]) * sin_t

    # ---- self-attention branch (pre-LN, RoPE, no causal mask) --------------
    xn = _layernorm(x, ln1_g[0], ln1_b[0])
    q = mm(xn, wq[0]) + bq[0]            # Wq/bq pre-scaled by 1/sqrt(dh)
    k = mm(xn, wk[0]) + bk[0]
    v = mm(xn, wv[0]) + bv[0]

    head_outs = []
    for h in range(nhead):               # static head loop; batch dim is batched
        c0 = h * dh
        qh = rope(q[:, c0:c0 + dh])                      # (rows, dh)
        kh = rope(k[:, c0:c0 + dh])
        vh = v[:, c0:c0 + dh]
        qh3 = cast(qh).reshape(bb, seq_len, dh)
        kh3 = cast(kh).reshape(bb, seq_len, dh)
        vh3 = cast(vh).reshape(bb, seq_len, dh)
        # Batched over the batch-block dim; contracts last dims (no .T).
        s = jnp.einsum("btd,bsd->bts", qh3, kh3,
                       preferred_element_type=jnp.float32)   # (bb, T, T)
        s = s - jnp.max(s, axis=-1, keepdims=True)
        p = jnp.exp(s)
        denom = jnp.sum(p, axis=-1, keepdims=True)            # (bb, T, 1)
        o_h = jnp.einsum("bts,bsd->btd", cast(p), vh3,
                         preferred_element_type=jnp.float32)  # (bb, T, dh)
        # Normalize the small (T, dh) output (EUP reciprocal), not the (T, T)
        # probability matrix.
        o_h = o_h * pl.reciprocal(denom, approx=True)
        head_outs.append(o_h.reshape(rows, dh))

    attn = jnp.concatenate(head_outs, axis=-1)               # (rows, D) lane-dense
    x = x + mm(attn, wo[0]) + bo[0]

    # ---- MLP branch (pre-LN, GELU) ------------------------------------------
    xn2 = _layernorm(x, ln2_g[0], ln2_b[0])
    hdn = mm(xn2, w1[0]) + b1[0]
    hdn = jax.nn.gelu(hdn, approximate=True)
    x = x + mm(hdn, w2[0]) + b2[0]

    x_scr[...] = x                       # keep activation resident for next layer

    # Fused final LayerNorm + single HBM writeback on the last layer.
    @pl.when(layer == n_layers - 1)
    def _():
        o_ref[...] = _layernorm(x, lnf_g[...], lnf_b[...]).astype(o_ref.dtype)


# ---------------------------------------------------------------------------
# Wrapper
# ---------------------------------------------------------------------------
def _prod(shape):
    r = 1
    for s in shape:
        r *= int(s)
    return r


def _choose_batch_block(B, T, D):
    """Pick how many batch elements to fold into one grid block."""
    row_budget = max(8, (1 << 20) // max(D, 1))   # keeps the working set modest
    divisors = [d for d in range(1, B + 1) if B % d == 0]
    legal = [d for d in divisors if d == B or (d * T) % 8 == 0]   # (8,128) rule
    fitting = [d for d in legal if d * T <= row_budget] or legal
    # Prefer >=2 parallel blocks (v7x megacore) only when each block still has
    # >=256 rows (full 256-wide MXU panels); otherwise take the largest block
    # so weights are re-streamed from HBM as few times as possible (v5e/v6e).
    split = [d for d in fitting if B // d >= 2 and d * T >= 256]
    pool = split or fitting
    return max(pool)


def ccot_decoder_forward(x, params, lnf_g, lnf_b, cos, sin, nhead,
                         *, compute_dtype=jnp.bfloat16, batch_block=None):
    B, T, D = x.shape
    assert D % nhead == 0, "hidden size must be divisible by nhead"
    dh = D // nhead
    assert dh % 2 == 0, "RoPE rotate-half requires an even head dim"
    half = dh // 2
    L = params["wq"].shape[0]

    if batch_block is None:
        bb = _choose_batch_block(B, T, D)
    else:
        bb = batch_block
        assert B % bb == 0 and (bb == B or (bb * T) % 8 == 0)
    rows = bb * T
    nb = B // bb

    cdt = jnp.dtype(compute_dtype)
    scale = 1.0 / float(dh) ** 0.5

    # Host-side weight prep: fold the softmax scale into the Q projection and
    # cast matmul weights to the compute dtype (halves DMA + weight VMEM for
    # bf16).  Biases / LayerNorm params stay f32.
    prep = {}
    for n in PARAM_ORDER:
        w = params[n]
        if n in ("wq", "bq"):
            w = w * scale
        if n in _MATMUL_WEIGHTS:
            w = w.astype(cdt)
        prep[n] = w
    weights = [prep[n] for n in PARAM_ORDER]

    # RoPE tables tiled to the (rows, dh) activation panel, plus the
    # rotate-half permutation (with signs) as a small matrix for the MXU.
    cos_r = jnp.tile(cos.astype(jnp.float32), (bb, 1))       # (rows, dh)
    sin_r = jnp.tile(sin.astype(jnp.float32), (bb, 1))       # (rows, dh)
    i = jnp.arange(half)
    rot = jnp.zeros((dh, dh), jnp.float32)
    rot = rot.at[i + half, i].set(-1.0)                      # -x2 -> first half
    rot = rot.at[i, i + half].set(1.0)                       #  x1 -> second half
    rot = rot.astype(cdt)

    # Lane-dense 2-D layout for activations: host-side reshape is free and
    # removes every in-kernel activation reshape along the hidden dim.
    x_flat = x.reshape(B * T, D)

    def wspec(arr):
        zeros = (0,) * (arr.ndim - 1)
        return pl.BlockSpec((1,) + tuple(arr.shape[1:]),
                            lambda b, l, _z=zeros: (l,) + _z)

    const2d = lambda b, l: (0, 0)
    in_specs = (
        [pl.BlockSpec((rows, D), lambda b, l: (b, 0)),
         pl.BlockSpec((rows, dh), const2d),
         pl.BlockSpec((rows, dh), const2d),
         pl.BlockSpec((dh, dh), const2d)]
        + [wspec(w) for w in weights]
        + [pl.BlockSpec(tuple(lnf_g.shape), const2d),
           pl.BlockSpec(tuple(lnf_b.shape), const2d)]
    )
    out_spec = pl.BlockSpec((rows, D), lambda b, l: (b, 0))

    # Explicit VMEM budget from the actual working set, clamped to the chip's
    # physical VMEM (64 MiB on v7x, 128 MiB on v5e/v6e).
    w_block_bytes = sum(_prod(w.shape[1:]) * jnp.dtype(w.dtype).itemsize
                        for w in weights)
    act_blk = rows * D * jnp.dtype(x.dtype).itemsize
    rope_bytes = (2 * rows * dh + dh * dh) * 4 + 2 * D * 4
    transient = (rows * D * 4 * 8                # q,k,v,xn,attn,x transients (f32)
                 + rows * 4 * D * 4 * 2          # MLP hidden (f32 + cast copy)
                 + bb * T * T * 4 * 3)           # per-head scores / probs
    est = (2 * 2 * act_blk + 2 * w_block_bytes + 2 * rope_bytes
           + rows * D * 4 + transient)
    try:
        cap = int(pltpu.get_tpu_info().vmem_capacity_bytes)
    except Exception:
        cap = 64 * 2 ** 20
    vmem_limit = int(min(cap - 2 * 2 ** 20,
                         max(32 * 2 ** 20, int(1.5 * est))))

    out_flat = pl.pallas_call(
        functools.partial(fused_decoder_kernel, nhead=nhead, bb=bb,
                          seq_len=T, compute_dtype=cdt),
        out_shape=jax.ShapeDtypeStruct((B * T, D), x.dtype),
        grid=(nb, L),
        in_specs=in_specs,
        out_specs=out_spec,
        scratch_shapes=[
            pltpu.VMEM((rows, D), jnp.float32),   # resident activation
        ],
        compiler_params=pltpu.CompilerParams(
            dimension_semantics=("parallel", "arbitrary"),
            vmem_limit_bytes=vmem_limit,
        ),
    )(x_flat, cos_r, sin_r, rot, *weights, lnf_g, lnf_b)
    return out_flat.reshape(B, T, D)


# ---------------------------------------------------------------------------
# Pure-JAX reference (same math) for a correctness sanity check
# ---------------------------------------------------------------------------
def _ref_forward(x, params, lnf_g, lnf_b, cos, sin, nhead):
    B, T, D = x.shape
    dh = D // nhead
    L = params["wq"].shape[0]

    def ln(v, g, b):
        mu = jnp.mean(v, -1, keepdims=True)
        var = jnp.mean((v - mu) ** 2, -1, keepdims=True)
        return (v - mu) * jax.lax.rsqrt(var + 1e-5) * g + b

    def rot_half(t):
        t1, t2 = t[..., : dh // 2], t[..., dh // 2:]
        return jnp.concatenate([-t2, t1], axis=-1)

    for l in range(L):
        p = {n: params[n][l] for n in PARAM_ORDER}
        xn = ln(x, p["ln1_g"], p["ln1_b"])
        q = xn @ p["wq"] + p["bq"]
        k = xn @ p["wk"] + p["bk"]
        v = xn @ p["wv"] + p["bv"]
        q = q.reshape(B, T, nhead, dh).transpose(0, 2, 1, 3)
        k = k.reshape(B, T, nhead, dh).transpose(0, 2, 1, 3)
        v = v.reshape(B, T, nhead, dh).transpose(0, 2, 1, 3)
        c, s = cos[None, None], sin[None, None]
        q = q * c + rot_half(q) * s
        k = k * c + rot_half(k) * s
        a = jax.nn.softmax(
            jnp.einsum("bhtd,bhsd->bhts", q, k) / (float(dh) ** 0.5), axis=-1)
        o = jnp.einsum("bhts,bhsd->bhtd", a, v).transpose(0, 2, 1, 3).reshape(B, T, D)
        x = x + (o @ p["wo"] + p["bo"])
        xn2 = ln(x, p["ln2_g"], p["ln2_b"])
        h = jax.nn.gelu(xn2 @ p["w1"] + p["b1"], approximate=True)
        x = x + (h @ p["w2"] + p["b2"])
    return ln(x, lnf_g, lnf_b)


# ---------------------------------------------------------------------------
# Parameter / RoPE-table construction (deterministic, synthetic)
# ---------------------------------------------------------------------------
def make_params(key, num_layers, D):
    stacked = {n: [] for n in PARAM_ORDER}

    def nrm(k, shape, scale):
        return scale * jax.random.normal(k, shape, jnp.float32)

    for _ in range(num_layers):
        key, *ks = jax.random.split(key, 17)
        layer = {
            "ln1_g": 1.0 + nrm(ks[0], (1, D), 0.1),
            "ln1_b": nrm(ks[1], (1, D), 0.1),
            "wq": nrm(ks[2], (D, D), 0.02), "bq": nrm(ks[3], (1, D), 0.02),
            "wk": nrm(ks[4], (D, D), 0.02), "bk": nrm(ks[5], (1, D), 0.02),
            "wv": nrm(ks[6], (D, D), 0.02), "bv": nrm(ks[7], (1, D), 0.02),
            "wo": nrm(ks[8], (D, D), 0.02), "bo": nrm(ks[9], (1, D), 0.02),
            "ln2_g": 1.0 + nrm(ks[10], (1, D), 0.1),
            "ln2_b": nrm(ks[11], (1, D), 0.1),
            "w1": nrm(ks[12], (D, 4 * D), 0.02), "b1": nrm(ks[13], (1, 4 * D), 0.02),
            "w2": nrm(ks[14], (4 * D, D), 0.02), "b2": nrm(ks[15], (1, D), 0.02),
        }
        for n in PARAM_ORDER:
            stacked[n].append(layer[n])
    params = {n: jnp.stack(v, axis=0) for n, v in stacked.items()}

    key, kg, kb = jax.random.split(key, 3)
    lnf_g = 1.0 + 0.1 * jax.random.normal(kg, (1, D), jnp.float32)
    lnf_b = 0.1 * jax.random.normal(kb, (1, D), jnp.float32)
    return params, lnf_g, lnf_b


def make_rope(T, dh):
    inv_freq = 1.0 / (10000.0 ** (jnp.arange(0, dh, 2, dtype=jnp.float32) / dh))
    pos = jnp.arange(T, dtype=jnp.float32)
    ang = pos[:, None] * inv_freq[None, :]                         # (T, dh/2)
    cos = jnp.concatenate([jnp.cos(ang), jnp.cos(ang)], axis=-1)   # (T, dh)
    sin = jnp.concatenate([jnp.sin(ang), jnp.sin(ang)], axis=-1)
    return cos, sin


# ---------------------------------------------------------------------------
if __name__ == "__main__":
    # Small config consistent with CCoTConfig (scaled down):
    # decoder_hidden_size=32, decoder_head=4, num_decoder_layers=2, seq=8, batch=2
    B, T, D, NHEAD, NLAYERS = 2, 8, 32, 4, 2
    dh = D // NHEAD

    key = jax.random.PRNGKey(0)
    kx, kp = jax.random.split(key)
    x = jax.random.normal(kx, (B, T, D), jnp.float32)

    params, lnf_g, lnf_b = make_params(kp, NLAYERS, D)
    cos, sin = make_rope(T, dh)

    ref = _ref_forward(x, params, lnf_g, lnf_b, cos, sin, NHEAD)

    # f32 compute path: tight check of the kernel's math.
    out_f32 = ccot_decoder_forward(x, params, lnf_g, lnf_b, cos, sin, NHEAD,
                                   compute_dtype=jnp.float32)
    out_f32 = jax.block_until_ready(out_f32)
    assert out_f32.shape == (B, T, D)
    assert jnp.allclose(out_f32, ref, atol=5e-3, rtol=5e-3), \
        "f32 kernel mismatch vs JAX reference"

    # Default bf16 fast path: MXU-native matmuls, f32 accumulation/statistics.
    out_bf16 = ccot_decoder_forward(x, params, lnf_g, lnf_b, cos, sin, NHEAD)
    out_bf16 = jax.block_until_ready(out_bf16)
    assert out_bf16.shape == (B, T, D)
    assert jnp.allclose(out_bf16, ref, atol=1e-1, rtol=5e-2), \
        "bf16 kernel deviates too much from JAX reference"

    print("KERNEL_OK")
</pallas_src>

<mosaic_0001>
module attributes {stable_mosaic.version = 11 : i64} {
  func.func @fused_decoder_kernel(%arg0: i32, %arg1: i32, %arg2: memref<16x32xf32, #tpu.memory_space<vmem>>, %arg3: memref<16x8xf32, #tpu.memory_space<vmem>>, %arg4: memref<16x8xf32, #tpu.memory_space<vmem>>, %arg5: memref<8x8xf32, #tpu.memory_space<vmem>>, %arg6: memref<1x1x32xf32, #tpu.memory_space<vmem>>, %arg7: memref<1x1x32xf32, #tpu.memory_space<vmem>>, %arg8: memref<1x32x32xf32, #tpu.memory_space<vmem>>, %arg9: memref<1x1x32xf32, #tpu.memory_space<vmem>>, %arg10: memref<1x32x32xf32, #tpu.memory_space<vmem>>, %arg11: memref<1x1x32xf32, #tpu.memory_space<vmem>>, %arg12: memref<1x32x32xf32, #tpu.memory_space<vmem>>, %arg13: memref<1x1x32xf32, #tpu.memory_space<vmem>>, %arg14: memref<1x32x32xf32, #tpu.memory_space<vmem>>, %arg15: memref<1x1x32xf32, #tpu.memory_space<vmem>>, %arg16: memref<1x1x32xf32, #tpu.memory_space<vmem>>, %arg17: memref<1x1x32xf32, #tpu.memory_space<vmem>>, %arg18: memref<1x32x128xf32, #tpu.memory_space<vmem>>, %arg19: memref<1x1x128xf32, #tpu.memory_space<vmem>>, %arg20: memref<1x128x32xf32, #tpu.memory_space<vmem>>, %arg21: memref<1x1x32xf32, #tpu.memory_space<vmem>>, %arg22: memref<1x32xf32, #tpu.memory_space<vmem>>, %arg23: memref<1x32xf32, #tpu.memory_space<vmem>>, %arg24: memref<16x32xf32, #tpu.memory_space<vmem>>, %arg25: memref<16x32xf32, #tpu.memory_space<vmem>>) attributes {dimension_semantics = [#tpu.dimension_semantics<parallel>, #tpu.dimension_semantics<arbitrary>], iteration_bounds = array<i64: 1, 2>, scalar_prefetch = 0 : i64, scratch_operands = 1 : i64, tpu.core_type = #tpu.core_type<tc>, window_params = [{transform_indices = @transform_0, window_bounds = array<i64: 16, 32>}, {pipeline_mode = #tpu.pipeline_mode<synchronous>, transform_indices = @transform_1, window_bounds = array<i64: 16, 8>}, {pipeline_mode = #tpu.pipeline_mode<synchronous>, transform_indices = @transform_2, window_bounds = array<i64: 16, 8>}, {pipeline_mode = #tpu.pipeline_mode<synchronous>, transform_indices = @transform_3, window_bounds = array<i64: 8, 8>}, {transform_indices = @transform_4, window_bounds = array<i64: 1, 1, 32>}, {transform_indices = @transform_5, window_bounds = array<i64: 1, 1, 32>}, {transform_indices = @transform_6, window_bounds = array<i64: 1, 32, 32>}, {transform_indices = @transform_7, window_bounds = array<i64: 1, 1, 32>}, {transform_indices = @transform_8, window_bounds = array<i64: 1, 32, 32>}, {transform_indices = @transform_9, window_bounds = array<i64: 1, 1, 32>}, {transform_indices = @transform_10, window_bounds = array<i64: 1, 32, 32>}, {transform_indices = @transform_11, window_bounds = array<i64: 1, 1, 32>}, {transform_indices = @transform_12, window_bounds = array<i64: 1, 32, 32>}, {transform_indices = @transform_13, window_bounds = array<i64: 1, 1, 32>}, {transform_indices = @transform_14, window_bounds = array<i64: 1, 1, 32>}, {transform_indices = @transform_15, window_bounds = array<i64: 1, 1, 32>}, {transform_indices = @transform_16, window_bounds = array<i64: 1, 32, 128>}, {transform_indices = @transform_17, window_bounds = array<i64: 1, 1, 128>}, {transform_indices = @transform_18, window_bounds = array<i64: 1, 128, 32>}, {transform_indices = @transform_19, window_bounds = array<i64: 1, 1, 32>}, {pipeline_mode = #tpu.pipeline_mode<synchronous>, transform_indices = @transform_20, window_bounds = array<i64: 1, 32>}, {pipeline_mode = #tpu.pipeline_mode<synchronous>, transform_indices = @transform_21, window_bounds = array<i64: 1, 32>}, {transform_indices = @transform_22, window_bounds = array<i64: 16, 32>}]} {
    %c0_i32 = arith.constant 0 : i32
    %0 = arith.cmpi eq, %arg1, %c0_i32 : i32
    %1 = arith.extui %0 : i1 to i32
    %c0_i32_0 = arith.constant 0 : i32
    %2 = arith.cmpi ne, %1, %c0_i32_0 : i32
    scf.if %2 {
      %c0_116 = arith.constant 0 : index
      %c0_117 = arith.constant 0 : index
      %236 = vector.load %arg2[%c0_116, %c0_117] : memref<16x32xf32, #tpu.memory_space<vmem>>, vector<16x32xf32>
      %c0_118 = arith.constant 0 : index
      %c0_119 = arith.constant 0 : index
      %237 = vector.load %arg25[%c0_118, %c0_119] : memref<16x32xf32, #tpu.memory_space<vmem>>, vector<16x32xf32>
      tpu.vector_store %arg25[%c0_118, %c0_119], %236 {strides = array<i32>} : memref<16x32xf32, #tpu.memory_space<vmem>>, vector<16x32xf32>,
    } else {
    }
    %c0 = arith.constant 0 : index
    %c0_1 = arith.constant 0 : index
    %3 = vector.load %arg25[%c0, %c0_1] : memref<16x32xf32, #tpu.memory_space<vmem>>, vector<16x32xf32>
    %c0_2 = arith.constant 0 : index
    %c0_3 = arith.constant 0 : index
    %4 = vector.load %arg3[%c0_2, %c0_3] : memref<16x8xf32, #tpu.memory_space<vmem>>, vector<16x8xf32>
    %c0_4 = arith.constant 0 : index
    %c0_5 = arith.constant 0 : index
    %5 = vector.load %arg4[%c0_4, %c0_5] : memref<16x8xf32, #tpu.memory_space<vmem>>, vector<16x8xf32>
    %c0_6 = arith.constant 0 : index
    %c0_7 = arith.constant 0 : index
    %c0_8 = arith.constant 0 : index
    %6 = vector.load %arg6[%c0_6, %c0_7, %c0_8] : memref<1x1x32xf32, #tpu.memory_space<vmem>>, vector<1x1x32xf32>
    %7 = vector.shape_cast %6 : vector<1x1x32xf32> to vector<1x32xf32>
    %c0_9 = arith.constant 0 : index
    %c0_10 = arith.constant 0 : index
    %c0_11 = arith.constant 0 : index
    %8 = vector.load %arg7[%c0_9, %c0_10, %c0_11] : memref<1x1x32xf32, #tpu.memory_space<vmem>>, vector<1x1x32xf32>
    %9 = vector.shape_cast %8 : vector<1x1x32xf32> to vector<1x32xf32>
    %cst = arith.constant dense<0.000000e+00> : vector<16xf32>
    %10 = vector.multi_reduction <add>, %3, %cst [1] : vector<16x32xf32> to vector<16xf32>
    %11 = vector.shape_cast %10 : vector<16xf32> to vector<16x1xf32>
    %cst_12 = arith.constant 3.200000e+01 : f32
    %12 = vector.broadcast %cst_12 : f32 to vector<16x1xf32>
    %13 = arith.divf %11, %12 : vector<16x1xf32>
    %14 = vector.broadcast %13 : vector<16x1xf32> to vector<16x32xf32>
    %15 = arith.subf %3, %14 : vector<16x32xf32>
    %16 = arith.mulf %15, %15 : vector<16x32xf32>
    %cst_13 = arith.constant dense<0.000000e+00> : vector<16xf32>
    %17 = vector.multi_reduction <add>, %16, %cst_13 [1] : vector<16x32xf32> to vector<16xf32>
    %18 = vector.shape_cast %17 : vector<16xf32> to vector<16x1xf32>
    %cst_14 = arith.constant 3.200000e+01 : f32
    %19 = vector.broadcast %cst_14 : f32 to vector<16x1xf32>
    %20 = arith.divf %18, %19 : vector<16x1xf32>
    %21 = vector.broadcast %13 : vector<16x1xf32> to vector<16x32xf32>
    %22 = arith.subf %3, %21 : vector<16x32xf32>
    %cst_15 = arith.constant 9.99999974E-6 : f32
    %23 = vector.broadcast %cst_15 : f32 to vector<16x1xf32>
    %24 = arith.addf %20, %23 : vector<16x1xf32>
    %25 = math.rsqrt %24 : vector<16x1xf32>
    %26 = vector.broadcast %25 : vector<16x1xf32> to vector<16x32xf32>
    %27 = arith.mulf %22, %26 : vector<16x32xf32>
    %28 = vector.broadcast %7 : vector<1x32xf32> to vector<16x32xf32>
    %29 = arith.mulf %27, %28 : vector<16x32xf32>
    %30 = vector.broadcast %9 : vector<1x32xf32> to vector<16x32xf32>
    %31 = arith.addf %29, %30 : vector<16x32xf32>
    %c0_16 = arith.constant 0 : index
    %c0_17 = arith.constant 0 : index
    %c0_18 = arith.constant 0 : index
    %32 = vector.load %arg8[%c0_16, %c0_17, %c0_18] : memref<1x32x32xf32, #tpu.memory_space<vmem>>, vector<1x32x32xf32>
    %33 = vector.shape_cast %32 : vector<1x32x32xf32> to vector<32x32xf32>
    %cst_19 = arith.constant dense<0.000000e+00> : vector<16x32xf32>
    %34 = tpu.matmul %31, %33, %cst_19 {dimension_numbers = #tpu.dot_dimension_numbers<[1], [0], [0], [1], [0, 0, 1, 1], [], []>} : vector<16x32xf32>, vector<32x32xf32>, vector<16x32xf32> -> vector<16x32xf32>
    %c0_20 = arith.constant 0 : index
    %c0_21 = arith.constant 0 : index
    %c0_22 = arith.constant 0 : index
    %35 = vector.load %arg9[%c0_20, %c0_21, %c0_22] : memref<1x1x32xf32, #tpu.memory_space<vmem>>, vector<1x1x32xf32>
    %36 = vector.shape_cast %35 : vector<1x1x32xf32> to vector<1x32xf32>
    %37 = vector.broadcast %36 : vector<1x32xf32> to vector<16x32xf32>
    %38 = arith.addf %34, %37 : vector<16x32xf32>
    %c0_23 = arith.constant 0 : index
    %c0_24 = arith.constant 0 : index
    %c0_25 = arith.constant 0 : index
    %39 = vector.load %arg10[%c0_23, %c0_24, %c0_25] : memref<1x32x32xf32, #tpu.memory_space<vmem>>, vector<1x32x32xf32>
    %40 = vector.shape_cast %39 : vector<1x32x32xf32> to vector<32x32xf32>
    %cst_26 = arith.constant dense<0.000000e+00> : vector<16x32xf32>
    %41 = tpu.matmul %31, %40, %cst_26 {dimension_numbers = #tpu.dot_dimension_numbers<[1], [0], [0], [1], [0, 0, 1, 1], [], []>} : vector<16x32xf32>, vector<32x32xf32>, vector<16x32xf32> -> vector<16x32xf32>
    %c0_27 = arith.constant 0 : index
    %c0_28 = arith.constant 0 : index
    %c0_29 = arith.constant 0 : index
    %42 = vector.load %arg11[%c0_27, %c0_28, %c0_29] : memref<1x1x32xf32, #tpu.memory_space<vmem>>, vector<1x1x32xf32>
    %43 = vector.shape_cast %42 : vector<1x1x32xf32> to vector<1x32xf32>
    %44 = vector.broadcast %43 : vector<1x32xf32> to vector<16x32xf32>
    %45 = arith.addf %41, %44 : vector<16x32xf32>
    %c0_30 = arith.constant 0 : index
    %c0_31 = arith.constant 0 : index
    %c0_32 = arith.constant 0 : index
    %46 = vector.load %arg12[%c0_30, %c0_31, %c0_32] : memref<1x32x32xf32, #tpu.memory_space<vmem>>, vector<1x32x32xf32>
    %47 = vector.shape_cast %46 : vector<1x32x32xf32> to vector<32x32xf32>
    %cst_33 = arith.constant dense<0.000000e+00> : vector<16x32xf32>
    %48 = tpu.matmul %31, %47, %cst_33 {dimension_numbers = #tpu.dot_dimension_numbers<[1], [0], [0], [1], [0, 0, 1, 1], [], []>} : vector<16x32xf32>, vector<32x32xf32>, vector<16x32xf32> -> vector<16x32xf32>
    %c0_34 = arith.constant 0 : index
    %c0_35 = arith.constant 0 : index
    %c0_36 = arith.constant 0 : index
    %49 = vector.load %arg13[%c0_34, %c0_35, %c0_36] : memref<1x1x32xf32, #tpu.memory_space<vmem>>, vector<1x1x32xf32>
    %50 = vector.shape_cast %49 : vector<1x1x32xf32> to vector<1x32xf32>
    %51 = vector.broadcast %50 : vector<1x32xf32> to vector<16x32xf32>
    %52 = arith.addf %48, %51 : vector<16x32xf32>
    %53 = vector.extract_strided_slice %38 {offsets = [0, 0], sizes = [16, 8], strides = [1, 1]} : vector<16x32xf32> to vector<16x8xf32>
    %54 = arith.mulf %53, %4 : vector<16x8xf32>
    %c0_37 = arith.constant 0 : index
    %c0_38 = arith.constant 0 : index
    %55 = vector.load %arg5[%c0_37, %c0_38] : memref<8x8xf32, #tpu.memory_space<vmem>>, vector<8x8xf32>
    %cst_39 = arith.constant dense<0.000000e+00> : vector<16x8xf32>
    %56 = tpu.matmul %53, %55, %cst_39 {dimension_numbers = #tpu.dot_dimension_numbers<[1], [0], [0], [1], [0, 0, 1, 1], [], []>} : vector<16x8xf32>, vector<8x8xf32>, vector<16x8xf32> -> vector<16x8xf32>
    %57 = arith.mulf %56, %5 : vector<16x8xf32>
    %58 = arith.addf %54, %57 : vector<16x8xf32>
    %59 = vector.extract_strided_slice %45 {offsets = [0, 0], sizes = [16, 8], strides = [1, 1]} : vector<16x32xf32> to vector<16x8xf32>
    %60 = arith.mulf %59, %4 : vector<16x8xf32>
    %c0_40 = arith.constant 0 : index
    %c0_41 = arith.constant 0 : index
    %61 = vector.load %arg5[%c0_40, %c0_41] : memref<8x8xf32, #tpu.memory_space<vmem>>, vector<8x8xf32>
    %cst_42 = arith.constant dense<0.000000e+00> : vector<16x8xf32>
    %62 = tpu.matmul %59, %61, %cst_42 {dimension_numbers = #tpu.dot_dimension_numbers<[1], [0], [0], [1], [0, 0, 1, 1], [], []>} : vector<16x8xf32>, vector<8x8xf32>, vector<16x8xf32> -> vector<16x8xf32>
    %63 = arith.mulf %62, %5 : vector<16x8xf32>
    %64 = arith.addf %60, %63 : vector<16x8xf32>
    %65 = vector.extract_strided_slice %52 {offsets = [0, 0], sizes = [16, 8], strides = [1, 1]} : vector<16x32xf32> to vector<16x8xf32>
    %66 = vector.shape_cast %58 : vector<16x8xf32> to vector<2x8x8xf32>
    %67 = vector.shape_cast %64 : vector<16x8xf32> to vector<2x8x8xf32>
    %68 = vector.shape_cast %65 : vector<16x8xf32> to vector<2x8x8xf32>
    "tpu.trace_start"() <{level = 10 : i32, message = "btd,bsd->bts"}> : () -> ()
    %cst_43 = arith.constant dense<0.000000e+00> : vector<2x8x8xf32>
    %69 = tpu.matmul %66, %67, %cst_43 {dimension_numbers = #tpu.dot_dimension_numbers<[2], [2], [1], [1], [0, 0, 0, 1, 1, 1], [0], [0]>} : vector<2x8x8xf32>, vector<2x8x8xf32>, vector<2x8x8xf32> -> vector<2x8x8xf32>
    "tpu.trace_stop"() : () -> ()
    %cst_44 = arith.constant dense<0xFF800000> : vector<2x8xf32>
    %70 = vector.multi_reduction <maximumf>, %69, %cst_44 [2] : vector<2x8x8xf32> to vector<2x8xf32>
    %71 = vector.shape_cast %70 : vector<2x8xf32> to vector<2x8x1xf32>
    %72 = vector.broadcast %71 : vector<2x8x1xf32> to vector<2x8x8xf32>
    %73 = arith.subf %69, %72 : vector<2x8x8xf32>
    %74 = math.exp %73 : vector<2x8x8xf32>
    %cst_45 = arith.constant dense<0.000000e+00> : vector<2x8xf32>
    %75 = vector.multi_reduction <add>, %74, %cst_45 [2] : vector<2x8x8xf32> to vector<2x8xf32>
    %76 = vector.shape_cast %75 : vector<2x8xf32> to vector<2x8x1xf32>
    "tpu.trace_start"() <{level = 10 : i32, message = "bts,bsd->btd"}> : () -> ()
    %cst_46 = arith.constant dense<0.000000e+00> : vector<2x8x8xf32>
    %77 = tpu.matmul %74, %68, %cst_46 {dimension_numbers = #tpu.dot_dimension_numbers<[2], [1], [1], [2], [0, 0, 0, 1, 1, 2], [0], [0]>} : vector<2x8x8xf32>, vector<2x8x8xf32>, vector<2x8x8xf32> -> vector<2x8x8xf32>
    "tpu.trace_stop"() : () -> ()
    %78 = tpu.reciprocal %76 {approx = true} : vector<2x8x1xf32> -> vector<2x8x1xf32>
    %79 = vector.broadcast %78 : vector<2x8x1xf32> to vector<2x8x8xf32>
    %80 = arith.mulf %77, %79 : vector<2x8x8xf32>
    %81 = vector.shape_cast %80 : vector<2x8x8xf32> to vector<16x8xf32>
    %82 = vector.extract_strided_slice %38 {offsets = [0, 8], sizes = [16, 8], strides = [1, 1]} : vector<16x32xf32> to vector<16x8xf32>
    %83 = arith.mulf %82, %4 : vector<16x8xf32>
    %c0_47 = arith.constant 0 : index
    %c0_48 = arith.constant 0 : index
    %84 = vector.load %arg5[%c0_47, %c0_48] : memref<8x8xf32, #tpu.memory_space<vmem>>, vector<8x8xf32>
    %cst_49 = arith.constant dense<0.000000e+00> : vector<16x8xf32>
    %85 = tpu.matmul %82, %84, %cst_49 {dimension_numbers = #tpu.dot_dimension_numbers<[1], [0], [0], [1], [0, 0, 1, 1], [], []>} : vector<16x8xf32>, vector<8x8xf32>, vector<16x8xf32> -> vector<16x8xf32>
    %86 = arith.mulf %85, %5 : vector<16x8xf32>
    %87 = arith.addf %83, %86 : vector<16x8xf32>
    %88 = vector.extract_strided_slice %45 {offsets = [0, 8], sizes = [16, 8], strides = [1, 1]} : vector<16x32xf32> to vector<16x8xf32>
    %89 = arith.mulf %88, %4 : vector<16x8xf32>
    %c0_50 = arith.constant 0 : index
    %c0_51 = arith.constant 0 : index
    %90 = vector.load %arg5[%c0_50, %c0_51] : memref<8x8xf32, #tpu.memory_space<vmem>>, vector<8x8xf32>
    %cst_52 = arith.constant dense<0.000000e+00> : vector<16x8xf32>
    %91 = tpu.matmul %88, %90, %cst_52 {dimension_numbers = #tpu.dot_dimension_numbers<[1], [0], [0], [1], [0, 0, 1, 1], [], []>} : vector<16x8xf32>, vector<8x8xf32>, vector<16x8xf32> -> vector<16x8xf32>
    %92 = arith.mulf %91, %5 : vector<16x8xf32>
    %93 = arith.addf %89, %92 : vector<16x8xf32>
    %94 = vector.extract_strided_slice %52 {offsets = [0, 8], sizes = [16, 8], strides = [1, 1]} : vector<16x32xf32> to vector<16x8xf32>
    %95 = vector.shape_cast %87 : vector<16x8xf32> to vector<2x8x8xf32>
    %96 = vector.shape_cast %93 : vector<16x8xf32> to vector<2x8x8xf32>
    %97 = vector.shape_cast %94 : vector<16x8xf32> to vector<2x8x8xf32>
    "tpu.trace_start"() <{level = 10 : i32, message = "btd,bsd->bts"}> : () -> ()
    %cst_53 = arith.constant dense<0.000000e+00> : vector<2x8x8xf32>
    %98 = tpu.matmul %95, %96, %cst_53 {dimension_numbers = #tpu.dot_dimension_numbers<[2], [2], [1], [1], [0, 0, 0, 1, 1, 1], [0], [0]>} : vector<2x8x8xf32>, vector<2x8x8xf32>, vector<2x8x8xf32> -> vector<2x8x8xf32>
    "tpu.trace_stop"() : () -> ()
    %cst_54 = arith.constant dense<0xFF800000> : vector<2x8xf32>
    %99 = vector.multi_reduction <maximumf>, %98, %cst_54 [2] : vector<2x8x8xf32> to vector<2x8xf32>
    %100 = vector.shape_cast %99 : vector<2x8xf32> to vector<2x8x1xf32>
    %101 = vector.broadcast %100 : vector<2x8x1xf32> to vector<2x8x8xf32>
    %102 = arith.subf %98, %101 : vector<2x8x8xf32>
    %103 = math.exp %102 : vector<2x8x8xf32>
    %cst_55 = arith.constant dense<0.000000e+00> : vector<2x8xf32>
    %104 = vector.multi_reduction <add>, %103, %cst_55 [2] : vector<2x8x8xf32> to vector<2x8xf32>
    %105 = vector.shape_cast %104 : vector<2x8xf32> to vector<2x8x1xf32>
    "tpu.trace_start"() <{level = 10 : i32, message = "bts,bsd->btd"}> : () -> ()
    %cst_56 = arith.constant dense<0.000000e+00> : vector<2x8x8xf32>
    %106 = tpu.matmul %103, %97, %cst_56 {dimension_numbers = #tpu.dot_dimension_numbers<[2], [1], [1], [2], [0, 0, 0, 1, 1, 2], [0], [0]>} : vector<2x8x8xf32>, vector<2x8x8xf32>, vector<2x8x8xf32> -> vector<2x8x8xf32>
    "tpu.trace_stop"() : () -> ()
    %107 = tpu.reciprocal %105 {approx = true} : vector<2x8x1xf32> -> vector<2x8x1xf32>
    %108 = vector.broadcast %107 : vector<2x8x1xf32> to vector<2x8x8xf32>
    %109 = arith.mulf %106, %108 : vector<2x8x8xf32>
    %110 = vector.shape_cast %109 : vector<2x8x8xf32> to vector<16x8xf32>
    %111 = vector.extract_strided_slice %38 {offsets = [0, 16], sizes = [16, 8], strides = [1, 1]} : vector<16x32xf32> to vector<16x8xf32>
    %112 = arith.mulf %111, %4 : vector<16x8xf32>
    %c0_57 = arith.constant 0 : index
    %c0_58 = arith.constant 0 : index
    %113 = vector.load %arg5[%c0_57, %c0_58] : memref<8x8xf32, #tpu.memory_space<vmem>>, vector<8x8xf32>
    %cst_59 = arith.constant dense<0.000000e+00> : vector<16x8xf32>
    %114 = tpu.matmul %111, %113, %cst_59 {dimension_numbers = #tpu.dot_dimension_numbers<[1], [0], [0], [1], [0, 0, 1, 1], [], []>} : vector<16x8xf32>, vector<8x8xf32>, vector<16x8xf32> -> vector<16x8xf32>
    %115 = arith.mulf %114, %5 : vector<16x8xf32>
    %116 = arith.addf %112, %115 : vector<16x8xf32>
    %117 = vector.extract_strided_slice %45 {offsets = [0, 16], sizes = [16, 8], strides = [1, 1]} : vector<16x32xf32> to vector<16x8xf32>
    %118 = arith.mulf %117, %4 : vector<16x8xf32>
    %c0_60 = arith.constant 0 : index
    %c0_61 = arith.constant 0 : index
    %119 = vector.load %arg5[%c0_60, %c0_61] : memref<8x8xf32, #tpu.memory_space<vmem>>, vector<8x8xf32>
    %cst_62 = arith.constant dense<0.000000e+00> : vector<16x8xf32>
    %120 = tpu.matmul %117, %119, %cst_62 {dimension_numbers = #tpu.dot_dimension_numbers<[1], [0], [0], [1], [0, 0, 1, 1], [], []>} : vector<16x8xf32>, vector<8x8xf32>, vector<16x8xf32> -> vector<16x8xf32>
    %121 = arith.mulf %120, %5 : vector<16x8xf32>
    %122 = arith.addf %118, %121 : vector<16x8xf32>
    %123 = vector.extract_strided_slice %52 {offsets = [0, 16], sizes = [16, 8], strides = [1, 1]} : vector<16x32xf32> to vector<16x8xf32>
    %124 = vector.shape_cast %116 : vector<16x8xf32> to vector<2x8x8xf32>
    %125 = vector.shape_cast %122 : vector<16x8xf32> to vector<2x8x8xf32>
    %126 = vector.shape_cast %123 : vector<16x8xf32> to vector<2x8x8xf32>
    "tpu.trace_start"() <{level = 10 : i32, message = "btd,bsd->bts"}> : () -> ()
    %cst_63 = arith.constant dense<0.000000e+00> : vector<2x8x8xf32>
    %127 = tpu.matmul %124, %125, %cst_63 {dimension_numbers = #tpu.dot_dimension_numbers<[2], [2], [1], [1], [0, 0, 0, 1, 1, 1], [0], [0]>} : vector<2x8x8xf32>, vector<2x8x8xf32>, vector<2x8x8xf32> -> vector<2x8x8xf32>
    "tpu.trace_stop"() : () -> ()
    %cst_64 = arith.constant dense<0xFF800000> : vector<2x8xf32>
    %128 = vector.multi_reduction <maximumf>, %127, %cst_64 [2] : vector<2x8x8xf32> to vector<2x8xf32>
    %129 = vector.shape_cast %128 : vector<2x8xf32> to vector<2x8x1xf32>
    %130 = vector.broadcast %129 : vector<2x8x1xf32> to vector<2x8x8xf32>
    %131 = arith.subf %127, %130 : vector<2x8x8xf32>
    %132 = math.exp %131 : vector<2x8x8xf32>
    %cst_65 = arith.constant dense<0.000000e+00> : vector<2x8xf32>
    %133 = vector.multi_reduction <add>, %132, %cst_65 [2] : vector<2x8x8xf32> to vector<2x8xf32>
    %134 = vector.shape_cast %133 : vector<2x8xf32> to vector<2x8x1xf32>
    "tpu.trace_start"() <{level = 10 : i32, message = "bts,bsd->btd"}> : () -> ()
    %cst_66 = arith.constant dense<0.000000e+00> : vector<2x8x8xf32>
    %135 = tpu.matmul %132, %126, %cst_66 {dimension_numbers = #tpu.dot_dimension_numbers<[2], [1], [1], [2], [0, 0, 0, 1, 1, 2], [0], [0]>} : vector<2x8x8xf32>, vector<2x8x8xf32>, vector<2x8x8xf32> -> vector<2x8x8xf32>
    "tpu.trace_stop"() : () -> ()
    %136 = tpu.reciprocal %134 {approx = true} : vector<2x8x1xf32> -> vector<2x8x1xf32>
    %137 = vector.broadcast %136 : vector<2x8x1xf32> to vector<2x8x8xf32>
    %138 = arith.mulf %135, %137 : vector<2x8x8xf32>
    %139 = vector.shape_cast %138 : vector<2x8x8xf32> to vector<16x8xf32>
    %140 = vector.extract_strided_slice %38 {offsets = [0, 24], sizes = [16, 8], strides = [1, 1]} : vector<16x32xf32> to vector<16x8xf32>
    %141 = arith.mulf %140, %4 : vector<16x8xf32>
    %c0_67 = arith.constant 0 : index
    %c0_68 = arith.constant 0 : index
    %142 = vector.load %arg5[%c0_67, %c0_68] : memref<8x8xf32, #tpu.memory_space<vmem>>, vector<8x8xf32>
    %cst_69 = arith.constant dense<0.000000e+00> : vector<16x8xf32>
    %143 = tpu.matmul %140, %142, %cst_69 {dimension_numbers = #tpu.dot_dimension_numbers<[1], [0], [0], [1], [0, 0, 1, 1], [], []>} : vector<16x8xf32>, vector<8x8xf32>, vector<16x8xf32> -> vector<16x8xf32>
    %144 = arith.mulf %143, %5 : vector<16x8xf32>
    %145 = arith.addf %141, %144 : vector<16x8xf32>
    %146 = vector.extract_strided_slice %45 {offsets = [0, 24], sizes = [16, 8], strides = [1, 1]} : vector<16x32xf32> to vector<16x8xf32>
    %147 = arith.mulf %146, %4 : vector<16x8xf32>
    %c0_70 = arith.constant 0 : index
    %c0_71 = arith.constant 0 : index
    %148 = vector.load %arg5[%c0_70, %c0_71] : memref<8x8xf32, #tpu.memory_space<vmem>>, vector<8x8xf32>
    %cst_72 = arith.constant dense<0.000000e+00> : vector<16x8xf32>
    %149 = tpu.matmul %146, %148, %cst_72 {dimension_numbers = #tpu.dot_dimension_numbers<[1], [0], [0], [1], [0, 0, 1, 1], [], []>} : vector<16x8xf32>, vector<8x8xf32>, vector<16x8xf32> -> vector<16x8xf32>
    %150 = arith.mulf %149, %5 : vector<16x8xf32>
    %151 = arith.addf %147, %150 : vector<16x8xf32>
    %152 = vector.extract_strided_slice %52 {offsets = [0, 24], sizes = [16, 8], strides = [1, 1]} : vector<16x32xf32> to vector<16x8xf32>
    %153 = vector.shape_cast %145 : vector<16x8xf32> to vector<2x8x8xf32>
    %154 = vector.shape_cast %151 : vector<16x8xf32> to vector<2x8x8xf32>
    %155 = vector.shape_cast %152 : vector<16x8xf32> to vector<2x8x8xf32>
    "tpu.trace_start"() <{level = 10 : i32, message = "btd,bsd->bts"}> : () -> ()
    %cst_73 = arith.constant dense<0.000000e+00> : vector<2x8x8xf32>
    %156 = tpu.matmul %153, %154, %cst_73 {dimension_numbers = #tpu.dot_dimension_numbers<[2], [2], [1], [1], [0, 0, 0, 1, 1, 1], [0], [0]>} : vector<2x8x8xf32>, vector<2x8x8xf32>, vector<2x8x8xf32> -> vector<2x8x8xf32>
    "tpu.trace_stop"() : () -> ()
    %cst_74 = arith.constant dense<0xFF800000> : vector<2x8xf32>
    %157 = vector.multi_reduction <maximumf>, %156, %cst_74 [2] : vector<2x8x8xf32> to vector<2x8xf32>
    %158 = vector.shape_cast %157 : vector<2x8xf32> to vector<2x8x1xf32>
    %159 = vector.broadcast %158 : vector<2x8x1xf32> to vector<2x8x8xf32>
    %160 = arith.subf %156, %159 : vector<2x8x8xf32>
    %161 = math.exp %160 : vector<2x8x8xf32>
    %cst_75 = arith.constant dense<0.000000e+00> : vector<2x8xf32>
    %162 = vector.multi_reduction <add>, %161, %cst_75 [2] : vector<2x8x8xf32> to vector<2x8xf32>
    %163 = vector.shape_cast %162 : vector<2x8xf32> to vector<2x8x1xf32>
    "tpu.trace_start"() <{level = 10 : i32, message = "bts,bsd->btd"}> : () -> ()
    %cst_76 = arith.constant dense<0.000000e+00> : vector<2x8x8xf32>
    %164 = tpu.matmul %161, %155, %cst_76 {dimension_numbers = #tpu.dot_dimension_numbers<[2], [1], [1], [2], [0, 0, 0, 1, 1, 2], [0], [0]>} : vector<2x8x8xf32>, vector<2x8x8xf32>, vector<2x8x8xf32> -> vector<2x8x8xf32>
    "tpu.trace_stop"() : () -> ()
    %165 = tpu.reciprocal %163 {approx = true} : vector<2x8x1xf32> -> vector<2x8x1xf32>
    %166 = vector.broadcast %165 : vector<2x8x1xf32> to vector<2x8x8xf32>
    %167 = arith.mulf %164, %166 : vector<2x8x8xf32>
    %168 = vector.shape_cast %167 : vector<2x8x8xf32> to vector<16x8xf32>
    %169 = tpu.concatenate %81, %110, %139, %168 in 1 : vector<16x8xf32>, vector<16x8xf32>, vector<16x8xf32>, vector<16x8xf32> -> vector<16x32xf32>
    %c0_77 = arith.constant 0 : index
    %c0_78 = arith.constant 0 : index
    %c0_79 = arith.constant 0 : index
    %170 = vector.load %arg14[%c0_77, %c0_78, %c0_79] : memref<1x32x32xf32, #tpu.memory_space<vmem>>, vector<1x32x32xf32>
    %171 = vector.shape_cast %170 : vector<1x32x32xf32> to vector<32x32xf32>
    %cst_80 = arith.constant dense<0.000000e+00> : vector<16x32xf32>
    %172 = tpu.matmul %169, %171, %cst_80 {dimension_numbers = #tpu.dot_dimension_numbers<[1], [0], [0], [1], [0, 0, 1, 1], [], []>} : vector<16x32xf32>, vector<32x32xf32>, vector<16x32xf32> -> vector<16x32xf32>
    %173 = arith.addf %3, %172 : vector<16x32xf32>
    %c0_81 = arith.constant 0 : index
    %c0_82 = arith.constant 0 : index
    %c0_83 = arith.constant 0 : index
    %174 = vector.load %arg15[%c0_81, %c0_82, %c0_83] : memref<1x1x32xf32, #tpu.memory_space<vmem>>, vector<1x1x32xf32>
    %175 = vector.shape_cast %174 : vector<1x1x32xf32> to vector<1x32xf32>
    %176 = vector.broadcast %175 : vector<1x32xf32> to vector<16x32xf32>
    %177 = arith.addf %173, %176 : vector<16x32xf32>
    %c0_84 = arith.constant 0 : index
    %c0_85 = arith.constant 0 : index
    %c0_86 = arith.constant 0 : index
    %178 = vector.load %arg16[%c0_84, %c0_85, %c0_86] : memref<1x1x32xf32, #tpu.memory_space<vmem>>, vector<1x1x32xf32>
    %179 = vector.shape_cast %178 : vector<1x1x32xf32> to vector<1x32xf32>
    %c0_87 = arith.constant 0 : index
    %c0_88 = arith.constant 0 : index
    %c0_89 = arith.constant 0 : index
    %180 = vector.load %arg17[%c0_87, %c0_88, %c0_89] : memref<1x1x32xf32, #tpu.memory_space<vmem>>, vector<1x1x32xf32>
    %181 = vector.shape_cast %180 : vector<1x1x32xf32> to vector<1x32xf32>
    %cst_90 = arith.constant dense<0.000000e+00> : vector<16xf32>
    %182 = vector.multi_reduction <add>, %177, %cst_90 [1] : vector<16x32xf32> to vector<16xf32>
    %183 = vector.shape_cast %182 : vector<16xf32> to vector<16x1xf32>
    %cst_91 = arith.constant 3.200000e+01 : f32
    %184 = vector.broadcast %cst_91 : f32 to vector<16x1xf32>
    %185 = arith.divf %183, %184 : vector<16x1xf32>
    %186 = vector.broadcast %185 : vector<16x1xf32> to vector<16x32xf32>
    %187 = arith.subf %177, %186 : vector<16x32xf32>
    %188 = arith.mulf %187, %187 : vector<16x32xf32>
    %cst_92 = arith.constant dense<0.000000e+00> : vector<16xf32>
    %189 = vector.multi_reduction <add>, %188, %cst_92 [1] : vector<16x32xf32> to vector<16xf32>
    %190 = vector.shape_cast %189 : vector<16xf32> to vector<16x1xf32>
    %cst_93 = arith.constant 3.200000e+01 : f32
    %191 = vector.broadcast %cst_93 : f32 to vector<16x1xf32>
    %192 = arith.divf %190, %191 : vector<16x1xf32>
    %193 = vector.broadcast %185 : vector<16x1xf32> to vector<16x32xf32>
    %194 = arith.subf %177, %193 : vector<16x32xf32>
    %cst_94 = arith.constant 9.99999974E-6 : f32
    %195 = vector.broadcast %cst_94 : f32 to vector<16x1xf32>
    %196 = arith.addf %192, %195 : vector<16x1xf32>
    %197 = math.rsqrt %196 : vector<16x1xf32>
    %198 = vector.broadcast %197 : vector<16x1xf32> to vector<16x32xf32>
    %199 = arith.mulf %194, %198 : vector<16x32xf32>
    %200 = vector.broadcast %179 : vector<1x32xf32> to vector<16x32xf32>
    %201 = arith.mulf %199, %200 : vector<16x32xf32>
    %202 = vector.broadcast %181 : vector<1x32xf32> to vector<16x32xf32>
    %203 = arith.addf %201, %202 : vector<16x32xf32>
    %c0_95 = arith.constant 0 : index
    %c0_96 = arith.constant 0 : index
    %c0_97 = arith.constant 0 : index
    %204 = vector.load %arg18[%c0_95, %c0_96, %c0_97] : memref<1x32x128xf32, #tpu.memory_space<vmem>>, vector<1x32x128xf32>
    %205 = vector.shape_cast %204 : vector<1x32x128xf32> to vector<32x128xf32>
    %cst_98 = arith.constant dense<0.000000e+00> : vector<16x128xf32>
    %206 = tpu.matmul %203, %205, %cst_98 {dimension_numbers = #tpu.dot_dimension_numbers<[1], [0], [0], [1], [0, 0, 1, 1], [], []>} : vector<16x32xf32>, vector<32x128xf32>, vector<16x128xf32> -> vector<16x128xf32>
    %c0_99 = arith.constant 0 : index
    %c0_100 = arith.constant 0 : index
    %c0_101 = arith.constant 0 : index
    %207 = vector.load %arg19[%c0_99, %c0_100, %c0_101] : memref<1x1x128xf32, #tpu.memory_space<vmem>>, vector<1x1x128xf32>
    %208 = vector.shape_cast %207 : vector<1x1x128xf32> to vector<1x128xf32>
    %209 = vector.broadcast %208 : vector<1x128xf32> to vector<16x128xf32>
    %210 = arith.addf %206, %209 : vector<16x128xf32>
    %211 = arith.mulf %210, %210 : vector<16x128xf32>
    %212 = arith.mulf %210, %211 : vector<16x128xf32>
    %cst_102 = arith.constant 4.471500e-02 : f32
    %213 = vector.broadcast %cst_102 : f32 to vector<16x128xf32>
    %214 = arith.mulf %213, %212 : vector<16x128xf32>
    %215 = arith.addf %210, %214 : vector<16x128xf32>
    %cst_103 = arith.constant 0.797884583 : f32
    %216 = vector.broadcast %cst_103 : f32 to vector<16x128xf32>
    %217 = arith.mulf %216, %215 : vector<16x128xf32>
    %218 = math.tanh %217 : vector<16x128xf32>
    %cst_104 = arith.constant 1.000000e+00 : f32
    %219 = vector.broadcast %cst_104 : f32 to vector<16x128xf32>
    %220 = arith.addf %219, %218 : vector<16x128xf32>
    %cst_105 = arith.constant 5.000000e-01 : f32
    %221 = vector.broadcast %cst_105 : f32 to vector<16x128xf32>
    %222 = arith.mulf %221, %220 : vector<16x128xf32>
    %223 = arith.mulf %210, %222 : vector<16x128xf32>
    %c0_106 = arith.constant 0 : index
    %c0_107 = arith.constant 0 : index
    %c0_108 = arith.constant 0 : index
    %224 = vector.load %arg20[%c0_106, %c0_107, %c0_108] : memref<1x128x32xf32, #tpu.memory_space<vmem>>, vector<1x128x32xf32>
    %225 = vector.shape_cast %224 : vector<1x128x32xf32> to vector<128x32xf32>
    %cst_109 = arith.constant dense<0.000000e+00> : vector<16x32xf32>
    %226 = tpu.matmul %223, %225, %cst_109 {dimension_numbers = #tpu.dot_dimension_numbers<[1], [0], [0], [1], [0, 0, 1, 1], [], []>} : vector<16x128xf32>, vector<128x32xf32>, vector<16x32xf32> -> vector<16x32xf32>
    %227 = arith.addf %177, %226 : vector<16x32xf32>
    %c0_110 = arith.constant 0 : index
    %c0_111 = arith.constant 0 : index
    %c0_112 = arith.constant 0 : index
    %228 = vector.load %arg21[%c0_110, %c0_111, %c0_112] : memref<1x1x32xf32, #tpu.memory_space<vmem>>, vector<1x1x32xf32>
    %229 = vector.shape_cast %228 : vector<1x1x32xf32> to vector<1x32xf32>
    %230 = vector.broadcast %229 : vector<1x32xf32> to vector<16x32xf32>
    %231 = arith.addf %227, %230 : vector<16x32xf32>
    %c0_113 = arith.constant 0 : index
    %c0_114 = arith.constant 0 : index
    %232 = vector.load %arg25[%c0_113, %c0_114] : memref<16x32xf32, #tpu.memory_space<vmem>>, vector<16x32xf32>
    tpu.vector_store %arg25[%c0_113, %c0_114], %231 {strides = array<i32>} : memref<16x32xf32, #tpu.memory_space<vmem>>, vector<16x32xf32>,
    %c1_i32 = arith.constant 1 : i32
    %233 = arith.cmpi eq, %arg1, %c1_i32 : i32
    %234 = arith.extui %233 : i1 to i32
    %c0_i32_115 = arith.constant 0 : i32
    %235 = arith.cmpi ne, %234, %c0_i32_115 : i32
    scf.if %235 {
      %c0_116 = arith.constant 0 : index
      %c0_117 = arith.constant 0 : index
      %236 = vector.load %arg22[%c0_116, %c0_117] : memref<1x32xf32, #tpu.memory_space<vmem>>, vector<1x32xf32>
      %c0_118 = arith.constant 0 : index
      %c0_119 = arith.constant 0 : index
      %237 = vector.load %arg23[%c0_118, %c0_119] : memref<1x32xf32, #tpu.memory_space<vmem>>, vector<1x32xf32>
      %cst_120 = arith.constant dense<0.000000e+00> : vector<16xf32>
      %238 = vector.multi_reduction <add>, %231, %cst_120 [1] : vector<16x32xf32> to vector<16xf32>
      %239 = vector.shape_cast %238 : vector<16xf32> to vector<16x1xf32>
      %cst_121 = arith.constant 3.200000e+01 : f32
      %240 = vector.broadcast %cst_121 : f32 to vector<16x1xf32>
      %241 = arith.divf %239, %240 : vector<16x1xf32>
      %242 = vector.broadcast %241 : vector<16x1xf32> to vector<16x32xf32>
      %243 = arith.subf %231, %242 : vector<16x32xf32>
      %244 = arith.mulf %243, %243 : vector<16x32xf32>
      %cst_122 = arith.constant dense<0.000000e+00> : vector<16xf32>
      %245 = vector.multi_reduction <add>, %244, %cst_122 [1] : vector<16x32xf32> to vector<16xf32>
      %246 = vector.shape_cast %245 : vector<16xf32> to vector<16x1xf32>
      %cst_123 = arith.constant 3.200000e+01 : f32
      %247 = vector.broadcast %cst_123 : f32 to vector<16x1xf32>
      %248 = arith.divf %246, %247 : vector<16x1xf32>
      %249 = vector.broadcast %241 : vector<16x1xf32> to vector<16x32xf32>
      %250 = arith.subf %231, %249 : vector<16x32xf32>
      %cst_124 = arith.constant 9.99999974E-6 : f32
      %251 = vector.broadcast %cst_124 : f32 to vector<16x1xf32>
      %252 = arith.addf %248, %251 : vector<16x1xf32>
      %253 = math.rsqrt %252 : vector<16x1xf32>
      %254 = vector.broadcast %253 : vector<16x1xf32> to vector<16x32xf32>
      %255 = arith.mulf %250, %254 : vector<16x32xf32>
      %256 = vector.broadcast %236 : vector<1x32xf32> to vector<16x32xf32>
      %257 = arith.mulf %255, %256 : vector<16x32xf32>
      %258 = vector.broadcast %237 : vector<1x32xf32> to vector<16x32xf32>
      %259 = arith.addf %257, %258 : vector<16x32xf32>
      %c0_125 = arith.constant 0 : index
      %c0_126 = arith.constant 0 : index
      %260 = vector.load %arg24[%c0_125, %c0_126] : memref<16x32xf32, #tpu.memory_space<vmem>>, vector<16x32xf32>
      tpu.vector_store %arg24[%c0_125, %c0_126], %259 {strides = array<i32>} : memref<16x32xf32, #tpu.memory_space<vmem>>, vector<16x32xf32>,
    } else {
    }
    return
  }
  func.func @transform_0(%arg0: i32, %arg1: i32) -> (i32, i32) {
    %c0_i32 = arith.constant 0 : i32
    %c0_i32_0 = arith.constant 0 : i32
    return %arg0, %c0_i32 : i32, i32
  }
  func.func @transform_1(%arg0: i32, %arg1: i32) -> (i32, i32) {
    %c0_i32 = arith.constant 0 : i32
    %c0_i32_0 = arith.constant 0 : i32
    %c0_i32_1 = arith.constant 0 : i32
    return %c0_i32, %c0_i32_0 : i32, i32
  }
  func.func @transform_2(%arg0: i32, %arg1: i32) -> (i32, i32) {
    %c0_i32 = arith.constant 0 : i32
    %c0_i32_0 = arith.constant 0 : i32
    %c0_i32_1 = arith.constant 0 : i32
    return %c0_i32, %c0_i32_0 : i32, i32
  }
  func.func @transform_3(%arg0: i32, %arg1: i32) -> (i32, i32) {
    %c0_i32 = arith.constant 0 : i32
    %c0_i32_0 = arith.constant 0 : i32
    %c0_i32_1 = arith.constant 0 : i32
    return %c0_i32, %c0_i32_0 : i32, i32
  }
  func.func @transform_4(%arg0: i32, %arg1: i32) -> (i32, i32, i32) {
    %c0_i32 = arith.constant 0 : i32
    %c0_i32_0 = arith.constant 0 : i32
    %c0_i32_1 = arith.constant 0 : i32
    return %arg1, %c0_i32, %c0_i32_0 : i32, i32, i32
  }
  func.func @transform_5(%arg0: i32, %arg1: i32) -> (i32, i32, i32) {
    %c0_i32 = arith.constant 0 : i32
    %c0_i32_0 = arith.constant 0 : i32
    %c0_i32_1 = arith.constant 0 : i32
    return %arg1, %c0_i32, %c0_i32_0 : i32, i32, i32
  }
  func.func @transform_6(%arg0: i32, %arg1: i32) -> (i32, i32, i32) {
    %c0_i32 = arith.constant 0 : i32
    %c0_i32_0 = arith.constant 0 : i32
    %c0_i32_1 = arith.constant 0 : i32
    return %arg1, %c0_i32, %c0_i32_0 : i32, i32, i32
  }
  func.func @transform_7(%arg0: i32, %arg1: i32) -> (i32, i32, i32) {
    %c0_i32 = arith.constant 0 : i32
    %c0_i32_0 = arith.constant 0 : i32
    %c0_i32_1 = arith.constant 0 : i32
    return %arg1, %c0_i32, %c0_i32_0 : i32, i32, i32
  }
  func.func @transform_8(%arg0: i32, %arg1: i32) -> (i32, i32, i32) {
    %c0_i32 = arith.constant 0 : i32
    %c0_i32_0 = arith.constant 0 : i32
    %c0_i32_1 = arith.constant 0 : i32
    return %arg1, %c0_i32, %c0_i32_0 : i32, i32, i32
  }
  func.func @transform_9(%arg0: i32, %arg1: i32) -> (i32, i32, i32) {
    %c0_i32 = arith.constant 0 : i32
    %c0_i32_0 = arith.constant 0 : i32
    %c0_i32_1 = arith.constant 0 : i32
    return %arg1, %c0_i32, %c0_i32_0 : i32, i32, i32
  }
  func.func @transform_10(%arg0: i32, %arg1: i32) -> (i32, i32, i32) {
    %c0_i32 = arith.constant 0 : i32
    %c0_i32_0 = arith.constant 0 : i32
    %c0_i32_1 = arith.constant 0 : i32
    return %arg1, %c0_i32, %c0_i32_0 : i32, i32, i32
  }
  func.func @transform_11(%arg0: i32, %arg1: i32) -> (i32, i32, i32) {
    %c0_i32 = arith.constant 0 : i32
    %c0_i32_0 = arith.constant 0 : i32
    %c0_i32_1 = arith.constant 0 : i32
    return %arg1, %c0_i32, %c0_i32_0 : i32, i32, i32
  }
  func.func @transform_12(%arg0: i32, %arg1: i32) -> (i32, i32, i32) {
    %c0_i32 = arith.constant 0 : i32
    %c0_i32_0 = arith.constant 0 : i32
    %c0_i32_1 = arith.constant 0 : i32
    return %arg1, %c0_i32, %c0_i32_0 : i32, i32, i32
  }
  func.func @transform_13(%arg0: i32, %arg1: i32) -> (i32, i32, i32) {
    %c0_i32 = arith.constant 0 : i32
    %c0_i32_0 = arith.constant 0 : i32
    %c0_i32_1 = arith.constant 0 : i32
    return %arg1, %c0_i32, %c0_i32_0 : i32, i32, i32
  }
  func.func @transform_14(%arg0: i32, %arg1: i32) -> (i32, i32, i32) {
    %c0_i32 = arith.constant 0 : i32
    %c0_i32_0 = arith.constant 0 : i32
    %c0_i32_1 = arith.constant 0 : i32
    return %arg1, %c0_i32, %c0_i32_0 : i32, i32, i32
  }
  func.func @transform_15(%arg0: i32, %arg1: i32) -> (i32, i32, i32) {
    %c0_i32 = arith.constant 0 : i32
    %c0_i32_0 = arith.constant 0 : i32
    %c0_i32_1 = arith.constant 0 : i32
    return %arg1, %c0_i32, %c0_i32_0 : i32, i32, i32
  }
  func.func @transform_16(%arg0: i32, %arg1: i32) -> (i32, i32, i32) {
    %c0_i32 = arith.constant 0 : i32
    %c0_i32_0 = arith.constant 0 : i32
    %c0_i32_1 = arith.constant 0 : i32
    return %arg1, %c0_i32, %c0_i32_0 : i32, i32, i32
  }
  func.func @transform_17(%arg0: i32, %arg1: i32) -> (i32, i32, i32) {
    %c0_i32 = arith.constant 0 : i32
    %c0_i32_0 = arith.constant 0 : i32
    %c0_i32_1 = arith.constant 0 : i32
    return %arg1, %c0_i32, %c0_i32_0 : i32, i32, i32
  }
  func.func @transform_18(%arg0: i32, %arg1: i32) -> (i32, i32, i32) {
    %c0_i32 = arith.constant 0 : i32
    %c0_i32_0 = arith.constant 0 : i32
    %c0_i32_1 = arith.constant 0 : i32
    return %arg1, %c0_i32, %c0_i32_0 : i32, i32, i32
  }
  func.func @transform_19(%arg0: i32, %arg1: i32) -> (i32, i32, i32) {
    %c0_i32 = arith.constant 0 : i32
    %c0_i32_0 = arith.constant 0 : i32
    %c0_i32_1 = arith.constant 0 : i32
    return %arg1, %c0_i32, %c0_i32_0 : i32, i32, i32
  }
  func.func @transform_20(%arg0: i32, %arg1: i32) -> (i32, i32) {
    %c0_i32 = arith.constant 0 : i32
    %c0_i32_0 = arith.constant 0 : i32
    %c0_i32_1 = arith.constant 0 : i32
    return %c0_i32, %c0_i32_0 : i32, i32
  }
  func.func @transform_21(%arg0: i32, %arg1: i32) -> (i32, i32) {
    %c0_i32 = arith.constant 0 : i32
    %c0_i32_0 = arith.constant 0 : i32
    %c0_i32_1 = arith.constant 0 : i32
    return %c0_i32, %c0_i32_0 : i32, i32
  }
  func.func @transform_22(%arg0: i32, %arg1: i32) -> (i32, i32) {
    %c0_i32 = arith.constant 0 : i32
    %c0_i32_0 = arith.constant 0 : i32
    return %arg0, %c0_i32 : i32, i32
  }
}

</mosaic_0001>

<bundles_post_ra>
// kernel: tpu_custom_call.1
= control target key start
LH: loop header
LB: loop body
LE: loop exit
PB: predicated region body
PF: predicated region fallthrough
CT: control target
= control target key end

     0   :  { %s4311_s0 = inlined_call_operand.hbm [shape: f32[16,32], index: 0, kind: input, shape index: {}]   ;;  %s4312_s1 = inlined_call_operand.vmem [shape: f32[16,8], index: 1, kind: input, shape index: {}]   ;;  %s4313_s2 = inlined_call_operand.vmem [shape: f32[16,8], index: 2, kind: input, shape index: {}]   ;;  %s4314_s3 = inlined_call_operand.hbm [shape: f32[8,8], index: 3, kind: input, shape index: {}]   ;;  %s4315_s4 = inlined_call_operand.hbm [shape: f32[2,1,32], index: 4, kind: input, shape index: {}]   ;;  %s4316_s5 = inlined_call_operand.hbm [shape: f32[2,1,32], index: 5, kind: input, shape index: {}]   ;;  %s4317_s6 = inlined_call_operand.vmem [shape: f32[2,32,32], index: 6, kind: input, shape index: {}]   ;;  %s4318_s7 = inlined_call_operand.hbm [shape: f32[2,1,32], index: 7, kind: input, shape index: {}]   ;;  %s4319_s8 = inlined_call_operand.vmem [shape: f32[2,32,32], index: 8, kind: input, shape index: {}]   ;;  %s4320_s9 = inlined_call_operand.hbm [shape: f32[2,1,32], index: 9, kind: input, shape index: {}]   ;;  %s4321_s10 = inlined_call_operand.vmem [shape: f32[2,32,32], index: 10, kind: input, shape index: {}]   ;;  %s4322_s11 = inlined_call_operand.hbm [shape: f32[2,1,32], index: 11, kind: input, shape index: {}]   ;;  %s4323_s12 = inlined_call_operand.vmem [shape: f32[2,32,32], index: 12, kind: input, shape index: {}]   ;;  %s4324_s13 = inlined_call_operand.hbm [shape: f32[2,1,32], index: 13, kind: input, shape index: {}]   ;;  %s4325_s14 = inlined_call_operand.hbm [shape: f32[2,1,32], index: 14, kind: input, shape index: {}]   ;;  %s4326_s15 = inlined_call_operand.hbm [shape: f32[2,1,32], index: 15, kind: input, shape index: {}]   ;;  %s4327_s16 = inlined_call_operand.vmem [shape: f32[2,32,128], index: 16, kind: input, shape index: {}]   ;;  %s4328_s17 = inlined_call_operand.hbm [shape: f32[2,1,128], index: 17, kind: input, shape index: {}]   ;;  %s4329_s18 = inlined_call_operand.vmem [shape: f32[2,128,32], index: 18, kind: input, shape index: {}]   ;;  %s4330_s19 = inlined_call_operand.hbm [shape: f32[2,1,32], index: 19, kind: input, shape index: {}]   ;;  %s4331_s20 = inlined_call_operand.vmem [shape: f32[1,32], index: 20, kind: input, shape index: {}]   ;;  %s4332_s21 = inlined_call_operand.vmem [shape: f32[1,32], index: 21, kind: input, shape index: {}]   ;;  %s4333_s22 = inlined_call_operand.hbm [shape: f32[16,32], index: 22, kind: output, shape index: {}]  }
   0x1   :  { %4339 = sst [smem:[#allocation27_spill]] %s4311_s0 }
   0x2   :  { %4340 = sst [smem:[#allocation28_spill]] %s4312_s1 }
   0x3   :  { %4341 = sst [smem:[#allocation29_spill]] %s4313_s2 }
   0x4   :  { %4342 = sst [smem:[#allocation30_spill]] %s4314_s3 }
   0x5   :  { %4343 = sst [smem:[#allocation31_spill]] %s4315_s4 }
   0x6   :  { %4344 = sst [smem:[#allocation32_spill]] %s4316_s5 }
   0x7   :  { %4345 = sst [smem:[#allocation33_spill]] %s4317_s6 }
   0x8   :  { %4346 = sst [smem:[#allocation34_spill]] %s4318_s7 }
   0x9   :  { %4347 = sst [smem:[#allocation35_spill]] %s4319_s8 }
   0xa   :  { %4348 = sst [smem:[#allocation36_spill]] %s4320_s9 }
   0xb   :  { %4349 = sst [smem:[#allocation37_spill]] %s4321_s10 }
   0xc   :  { %4350 = sst [smem:[#allocation38_spill]] %s4322_s11 }
   0xd   :  { %4351 = sst [smem:[#allocation39_spill]] %s4323_s12 }
   0xe   :  { %4352 = sst [smem:[#allocation40_spill]] %s4324_s13 }
   0xf   :  { %4353 = sst [smem:[#allocation41_spill]] %s4325_s14 }
  0x10   :  { %4354 = sst [smem:[#allocation42_spill]] %s4326_s15 }
  0x11   :  { %4355 = sst [smem:[#allocation43_spill]] %s4327_s16 }
  0x12   :  { %4356 = sst [smem:[#allocation44_spill]] %s4329_s18 }
  0x13   :  { %4357 = sst [smem:[#allocation45_spill]] %s4331_s20 }
  0x14   :  { %4358 = sst [smem:[#allocation46_spill]] %s4332_s21 }
  0x15   :  { %4359 = sst [smem:[#allocation47_spill]] %s4333_s22 }
  0x16   :  { %27 = vsyncpa [#allocation4], 0 }
  0x17   :  { %28 = vsyncpa [#allocation7], 0 }
  0x18   :  { %29 = vsyncpa [#allocation5], 0  ;;  %s3682_s3 = smov 0   ;;  %s3684_s28 = smov 0  }
  0x19   :  { %s3686_s29 = smov 0   ;;  %s3688_s30 = smov 0  }
  0x1a   :  { %s3690_s4 = smov 0   ;;  %s3692_s0 = smov 0  }
  0x1b LB: > { %4360 = sst [smem:[#allocation23_spill]] %s3540_s29  ;;  %s3711_s23 = sadd.s32 4294967295, %s3552_s0   ;;  %s3552_s0 = sphi %s3692_s0, %s35_s0   ;;  %s3548_s4 = sphi %s3690_s4, %s4398_s4   ;;  %s3544_s30 = sphi %s3688_s30, %s4397_s30   ;;  %s3540_s29 = sphi %s3686_s29, %s4393_s29   ;;  %s3536_s28 = sphi %s3684_s28, %s4396_s28   ;;  %s3532_s3 = sphi %s3682_s3, %s4395_s3  }
  0x1c   : > { %4361 = sst [smem:[#allocation24_spill]] %s3552_s0  ;;  %s44_s1 = sadd.s32 1, %s3548_s4 }
  0x1d   : > { %p45_p0 = scmp.ge.s32.totalorder %s44_s1, 2  ;;  %s143_s5 = sadd.s32 1, %s3540_s29 }
  0x1e   : > { %p150_p1 = scmp.ne.s32.totalorder %s3540_s29, %s3536_s28  ;;  %p151_p2 = scmp.eq.s32.totalorder %s3552_s0, 0 }
  0x1f   : > { %s4400_s1 = smov (%p45_p0, %s44_s1), 0  ;;  %p156_p4 = scmp.ne.s32.totalorder %s3536_s28, %s3532_s3 }
  0x20   : > { %4362 = sst [smem:[#allocation25_spill]] %s4400_s1  ;;  %p3720_p3 = por %p151_p2, %p150_p1 }
  0x21   : > { %s140_s6 = ssub.s32 %s3548_s4, %s4400_s1  ;;  %p157_p5 = scmp.eq.s32.totalorder %s3711_s23, 0 }
  0x22   : > { %p141_p6 = scmp.eq.s32.totalorder %s140_s6, 0  ;;  %p2820_p7 = scmp.ge.s32.totalorder %s3552_s0, 1 }
  0x23   : > { %p3731_p8 = por %p157_p5, %p156_p4  ;;  %p625_p9 = scmp.lt.s32.totalorder %s3552_s0, 3 }
  0x24   : > { %s3737_s26 = scalar_select %p141_p6, %s3540_s29, %s143_s5  }
  0x25   : > { %p3739_p10 = pnand %p2820_p7, %p625_p9  ;;  %s4367_s6 = sld [smem:[#allocation27_spill]] }
  0x26   : > { %4365 = sst [smem:[#allocation26_spill]] %s3737_s26  ;;  %s3554_s22 = smov [#allocation3]  }
  0x27   : > { %p2934_p11 = pneg %p3739_p10  ;;  %s641_s21 = sshll.u32 %s3554_s22, 4  ;;  %s642_s21 = int_to_ptr.vmem [resolvable:$true] %s641_s21 }
  0x28   : > { %p2974_p13 = scmp.lt.s32.totalorder %s3552_s0, 2  ;;  %s3555_s26 = smov 128  }
  0x29   : > { %p3750_p12 = pnand %p2934_p11, %p157_p5  ;;  %s3556_s20 = smov 8  }
  0x2a   : > { %s3758_s27 = sand.u32 1, %s3540_s29   ;;  %p3762_p0 = pnand %p2974_p13, %p3720_p3 }
  0x2b   : > { %s639_s1 = sshll.u32 %s4367_s6, 4  ;;  %s679_s3 = sand.u32 1, %s3552_s0   ;;  %s640_s1 = int_to_ptr.hbm [resolvable:$true] %s639_s1 }
  0x2c   : > { %2937 = dma.hbm_to_vmem [thread:$0]  (!%p3750_p12), %s640_s1, 256, %s642_s21, [#allocation4], %s3555_s26, %s3555_s26, %s3556_s20  }
  0x2d   : > { %s4370_s16 = sld [smem:[#allocation31_spill]]  ;;  %s682_s10 = scalar_lea.vmem [#allocation8], %s3758_s27 }
  0x2e   : > { %s689_s20 = sshll.u32 %s682_s10, 4  ;;  %s3772_s1 = scalar_lea.sflag [#allocation4], %s679_s3  ;;  %s690_s20 = int_to_ptr.vmem [resolvable:$true] %s689_s20 }
  0x2f   : > { %s4371_s18 = sld [smem:[#allocation32_spill]]  ;;  %s699_s6 = scalar_lea.vmem [#allocation9], %s3758_s27 }
  0x30   : > { %s706_s29 = sshll.u32 %s699_s6, 4  ;;  %s4372_s7 = sld [smem:[#allocation34_spill]]  ;;  %s707_s29 = int_to_ptr.vmem [resolvable:$true] %s706_s29 }
  0x31   : > { %s4373_s9 = sld [smem:[#allocation36_spill]] }
  0x32   : > { %s4374_s11 = sld [smem:[#allocation38_spill]] }
  0x33   : > { %s685_s12 = scalar_lea.hbm %s4370_s16, %s3548_s4  ;;  %s4375_s13 = sld [smem:[#allocation40_spill]] }
  0x34   : > { %s687_s21 = sshll.u32 %s685_s12, 4  ;;  %s4376_s14 = sld [smem:[#allocation41_spill]]  ;;  %s688_s21 = int_to_ptr.hbm [resolvable:$true] %s687_s21 }
  0x35   : > { %2944 = dma.hbm_to_vmem [thread:$0]  (!%p3762_p0), %s688_s21, 16, %s690_s20, %s3772_s1  }
  0x36   : > { %s702_s16 = scalar_lea.hbm %s4371_s18, %s3548_s4  ;;  %s727_s20 = scalar_lea.hbm %s4372_s7, %s3548_s4 }
  0x37   : > { %s704_s10 = sshll.u32 %s702_s16, 4  ;;  %s724_s21 = scalar_lea.vmem [#allocation10], %s3758_s27  ;;  %s705_s10 = int_to_ptr.hbm [resolvable:$true] %s704_s10 }
  0x38   : > { %2947 = dma.hbm_to_vmem [thread:$0]  (!%p3762_p0), %s705_s10, 16, %s707_s29, %s3772_s1  }
  0x39   : > { %s731_s0 = sshll.u32 %s724_s21, 4  ;;  %s729_s24 = sshll.u32 %s727_s20, 4  ;;  %s732_s0 = int_to_ptr.vmem [resolvable:$true] %s731_s0  ;;  %s730_s24 = int_to_ptr.hbm [resolvable:$true] %s729_s24 }
  0x3a   : > { %2950 = dma.hbm_to_vmem [thread:$0]  (!%p3762_p0), %s730_s24, 16, %s732_s0, %s3772_s1  }
  0x3b   : > { %s752_s29 = scalar_lea.hbm %s4373_s9, %s3548_s4  ;;  %s749_s16 = scalar_lea.vmem [#allocation11], %s3758_s27 }
  0x3c   : > { %s756_s6 = sshll.u32 %s749_s16, 4  ;;  %s754_s10 = sshll.u32 %s752_s29, 4  ;;  %s757_s6 = int_to_ptr.vmem [resolvable:$true] %s756_s6  ;;  %s755_s10 = int_to_ptr.hbm [resolvable:$true] %s754_s10 }
  0x3d   : > { %2953 = dma.hbm_to_vmem [thread:$0]  (!%p3762_p0), %s755_s10, 16, %s757_s6, %s3772_s1  }
  0x3e   : > { %s777_s0 = scalar_lea.hbm %s4374_s11, %s3548_s4  ;;  %s774_s20 = scalar_lea.vmem [#allocation12], %s3758_s27 }
  0x3f   : > { %s781_s21 = sshll.u32 %s774_s20, 4  ;;  %s779_s24 = sshll.u32 %s777_s0, 4  ;;  %s782_s21 = int_to_ptr.vmem [resolvable:$true] %s781_s21  ;;  %s780_s24 = int_to_ptr.hbm [resolvable:$true] %s779_s24 }
  0x40   : > { %2956 = dma.hbm_to_vmem [thread:$0]  (!%p3762_p0), %s780_s24, 16, %s782_s21, %s3772_s1  }
  0x41   : > { %s802_s29 = scalar_lea.hbm %s4375_s13, %s3548_s4  ;;  %s799_s16 = scalar_lea.vmem [#allocation13], %s3758_s27 }
  0x42   : > { %s806_s6 = sshll.u32 %s799_s16, 4  ;;  %s804_s10 = sshll.u32 %s802_s29, 4  ;;  %s807_s6 = int_to_ptr.vmem [resolvable:$true] %s806_s6  ;;  %s805_s10 = int_to_ptr.hbm [resolvable:$true] %s804_s10 }
  0x43   : > { %2959 = dma.hbm_to_vmem [thread:$0]  (!%p3762_p0), %s805_s10, 16, %s807_s6, %s3772_s1  }
  0x44   : > { %s819_s0 = scalar_lea.hbm %s4376_s14, %s3548_s4  ;;  %s816_s20 = scalar_lea.vmem [#allocation14], %s3758_s27 }
  0x45   : > { %s823_s21 = sshll.u32 %s816_s20, 4  ;;  %s821_s24 = sshll.u32 %s819_s0, 4  ;;  %s824_s21 = int_to_ptr.vmem [resolvable:$true] %s823_s21  ;;  %s822_s24 = int_to_ptr.hbm [resolvable:$true] %s821_s24 }
  0x46   : > { %2962 = dma.hbm_to_vmem [thread:$0]  (!%p3762_p0), %s822_s24, 16, %s824_s21, %s3772_s1  }
  0x47   : > { %s4377_s15 = sld [smem:[#allocation42_spill]]  ;;  %s833_s16 = scalar_lea.vmem [#allocation15], %s3758_s27 }
  0x48   : > { %s840_s6 = sshll.u32 %s833_s16, 4  ;;  %s861_s0 = scalar_lea.hbm %s4328_s17, %s3548_s4  ;;  %s841_s6 = int_to_ptr.vmem [resolvable:$true] %s840_s6 }
  0x49   : > { %s858_s20 = scalar_lea.vmem [#allocation16], %s3758_s27  ;;  %s863_s24 = sshll.u32 %s861_s0, 4  ;;  %s864_s24 = int_to_ptr.hbm [resolvable:$true] %s863_s24 }
  0x4a   : > { %s865_s21 = sshll.u32 %s858_s20, 4  ;;  %s886_s7 = scalar_lea.hbm %s4330_s19, %s3548_s4  ;;  %s866_s21 = int_to_ptr.vmem [resolvable:$true] %s865_s21 }
  0x4b   : > { %s888_s0 = sshll.u32 %s886_s7, 4  ;;  %s883_s20 = scalar_lea.vmem [#allocation17], %s3758_s27  ;;  %s889_s0 = int_to_ptr.hbm [resolvable:$true] %s888_s0 }
  0x4c   : > { %s890_s9 = sshll.u32 %s883_s20, 4  ;;  %s891_s9 = int_to_ptr.vmem [resolvable:$true] %s890_s9 }
  0x4d   : > { %s836_s29 = scalar_lea.hbm %s4377_s15, %s3548_s4 }
  0x4e   : > { %s838_s10 = sshll.u32 %s836_s29, 4  ;;  %s4378_s29 = sld [smem:[#allocation30_spill]]  ;;  %s839_s10 = int_to_ptr.hbm [resolvable:$true] %s838_s10 }
  0x4f   : > { %2965 = dma.hbm_to_vmem [thread:$0]  (!%p3762_p0), %s839_s10, 16, %s841_s6, %s3772_s1  }
  0x50   : > { %2968 = dma.hbm_to_vmem [thread:$0]  (!%p3762_p0), %s864_s24, 16, %s866_s21, %s3772_s1  }
  0x51   : > { %s3557_s6 = smov [#allocation6]   ;;  %899 = sbr.rel (%p3739_p10) target bundleno = 3362 (0xd22), region = 108 }
  0x52   : > { %s662_s10 = sshll.u32 %s3557_s6, 4  ;;  %s663_s10 = int_to_ptr.vmem [resolvable:$true] %s662_s10 }
  0x53   : > { %2971 = dma.hbm_to_vmem [thread:$0]  (!%p3762_p0), %s889_s0, 16, %s891_s9, %s3772_s1  }
  0x54   : > { %s660_s16 = sshll.u32 %s4378_s29, 4  ;;  %s661_s16 = int_to_ptr.hbm [resolvable:$true] %s660_s16 }
  0x55   : > { %2940 = dma.hbm_to_vmem [thread:$0]  (!%p3750_p12), %s661_s16, 128, %s663_s10, [#allocation7]  }
  0x56   : > { %3515 = dma.done.wait (%p157_p5), [#allocation4], 256  }
  0x57   : > { %3517 = vsyncadd (%p157_p5), [#allocation4], 4294967040 }
  0x58   : > { %3519 = dma.done.wait (%p157_p5), [#allocation7], 128  }
  0x59   : > { %3521 = vsyncadd (%p157_p5), [#allocation7], 4294967168  ;;  %s911_s7 = sand.u32 1, %s3711_s23   ;;  %s3866_s9 = sand.u32 1, %s3536_s28  }
  0x5a   : > { %s912_s2 = scalar_lea.sflag [#allocation4], %s911_s7 }
  0x5b   : > { %3523 = dma.done.wait (%p3731_p8), %s912_s2, 160  }
  0x5c   : > { %3525 = vsyncadd (%p3731_p8), %s912_s2, 4294967136  ;;  %p1118_p1 = scmp.lt.s32.totalorder %s3544_s30, 1  ;;  %s4379_s26 = sld [smem:[#allocation33_spill]] }
  0x5d   : > { %s4380_s8 = sld [smem:[#allocation35_spill]]  ;;  %s932_s13 = scalar_lea.vmem [#allocation10], %s3866_s9 }
  0x5e   : > { %s1119_s27 = scalar_select %p1118_p1, %s3544_s30, 1 }
  0x5f   : > { %s4381_s12 = sld [smem:[#allocation37_spill]]  ;;  %s941_s6 = scalar_lea.vmem [#allocation11], %s3866_s9 }
  0x60   : > { %s2895_s22 = sshll.u32 %s1119_s27, 5  ;;  %s2900_s1 = sshll.u32 %s1119_s27, 7 }
  0x61   : > { %s4382_s7 = sld [smem:[#allocation39_spill]]  ;;  %s950_s10 = scalar_lea.vmem [#allocation12], %s3866_s9 }
  0x62   : > { %s3878_s25 = scalar_lea.vmem %s4379_s26, %s2895_s22  ;;  %s4383_s21 = sld [smem:[#allocation43_spill]] }
  0x63   : > { %s3883_s16 = scalar_lea.vmem %s4380_s8, %s2895_s22  ;;  %s4384_s18 = sld [smem:[#allocation44_spill]] }
  0x64   : > { %s923_s8 = scalar_lea.vmem [#allocation9], %s3866_s9  ;;  %s968_s14 = scalar_lea.vmem [#allocation14], %s3866_s9 }
  0x65   : > { %s3888_s3 = scalar_lea.vmem %s4381_s12, %s2895_s22  ;;  %s959_s12 = scalar_lea.vmem [#allocation13], %s3866_s9 }
  0x66   : > { %s977_s15 = scalar_lea.vmem [#allocation15], %s3866_s9  ;;  %s986_s0 = scalar_lea.vmem [#allocation16], %s3866_s9 }
  0x67   : > { %s3893_s2 = scalar_lea.vmem %s4382_s7, %s2895_s22  ;;  %s995_s20 = scalar_lea.vmem [#allocation17], %s3866_s9 }
  0x68   : > { %s3898_s24 = scalar_lea.vmem %s4383_s21, %s2895_s22  ;;  %p2839_p2 = scmp.ne.s32.totalorder %s3544_s30, 0 }
  0x69   : > { %s3903_s29 = scalar_lea.vmem %s4384_s18, %s2900_s1 }
  0x6a   : > { %1152 = sbr.rel (%p2839_p2) target bundleno = 114 (0x72), region = 160 }
  0x6f   : > { %v1153_v0 = vld [vmem:[#allocation3] sm:$0xff]  ;;  %vm1155_vm0 = vcmask 261120   ;;  %v1154_v1 = vld [vmem:[#allocation3 + $0x8] sm:$0xff] }
  0x70   : > { %1156 = vst.msk [vmem:[#allocation2] sm:$0xff] %vm1155_vm0, %v1153_v0 }
  0x71   : > { %1157 = vst.msk [vmem:[#allocation2 + $0x8] sm:$0xff] %vm1155_vm0, %v1154_v1 }
  0x72 PF: > { %vm1166_vm1 = vcmask 261120   ;;  %v3558_v6 = vmov 32.0   ;;  %v1231_v23 = vld [vmem:[%s3878_s25 + $0x18] sm:$0xff]  ;;  %v1230_v26 = vld [vmem:[%s3878_s25 + $0x10] sm:$0xff]  ;;  %v1229_v29 = vld [vmem:[%s3878_s25 + $0x8] sm:$0xff]  ;;  %s4385_s11 = scalar_lea.vmem [#allocation8], %s3866_s9 }
  0x73   : > { %3050 = vrcp.f32 %v3558_v6  ;;  %v1268_v24 = vld [vmem:[%s3883_s16 + $0x18] sm:$0xff]  ;;  %1254 = vmatpush.msra.mxu0 %v1231_v23  ;;  %v1267_v27 = vld [vmem:[%s3883_s16 + $0x10] sm:$0xff]  ;;  %v1266_v30 = vld [vmem:[%s3883_s16 + $0x8] sm:$0xff]  ;;  %vm1330_vm9 = vcmask 64512   ;;  %s4386_s22 = sld [smem:[#allocation28_spill]]  ;;  %s3560_s1 = smov 8  }
  0x74   : > { %v1299_v25 = vld [vmem:[%s3888_s3 + $0x18] sm:$0xff]  ;;  %1285 = vmatpush.msra.mxu1 %v1268_v24  ;;  %v1298_v28 = vld [vmem:[%s3888_s3 + $0x10] sm:$0xff]  ;;  %v1297_v31 = vld [vmem:[%s3888_s3 + $0x8] sm:$0xff]  ;;  %s4387_s7 = sld [smem:[#allocation29_spill]]  ;;  %vm2242_vm10 = vcmask 130048   ;;  %vm2245_vm11 = vcmask 195584  }
  0x75   : > { %1316 = vmatpush.msra.mxu2 %v1299_v25  ;;  %1255 = vmatpush.msra.mxu0 %v1230_v26  ;;  %v1228_v32 = vld [vmem:[%s3878_s25] sm:$0xff]  ;;  %s3561_s25 = smov 112   ;;  %p2890_p3 = scmp.ne.s32.totalorder %s3544_s30, 1 }
  0x76   : > { %1286 = vmatpush.msra.mxu1 %v1267_v27  ;;  %v1265_v33 = vld [vmem:[%s3883_s16] sm:$0xff]  ;;  %s4388_s30 = sld [smem:[#allocation45_spill]] (!%p2890_p3) }
  0x77   : > { %v3917_v3 = vld [vmem:[#allocation2] sm:$0xff]  ;;  %1317 = vmatpush.msra.mxu2 %v1298_v28  ;;  %1256 = vmatpush.msra.mxu0 %v1229_v29 }
  0x78   : > { %v3915_v2 = vld [vmem:[#allocation2 + $0x8] sm:$0xff]  ;;  %v1167_v5 = vsel %vm1166_vm1, %v3917_v3, 0.0  ;;  %1287 = vmatpush.msra.mxu1 %v1266_v30  ;;  %v1296_v34 = vld [vmem:[%s3888_s3] sm:$0xff] }
  0x79   : > { %v1170_v4 = vsel %vm1166_vm1, %v3915_v2, 0.0  ;;  %1168 = vadd.xlane.f32.xlu0 %v1167_v5  ;;  %v3051_v7 = vpop.eup %3050  ;;  %1318 = vmatpush.msra.mxu2 %v1297_v31  ;;  %v3040_v53 = vld [vmem:[%s4385_s11] ss:$0 sm:$0xff]  ;;  %v4023_v28 = vld [vmem:[%s4386_s22 + $0x8] sm:$0xff]  ;;  %s3564_s11 = smov 24  }
  0x7a   : > { %1171 = vadd.xlane.f32.xlu1 %v1170_v4  ;;  %v1174_v8 = vmul.f32 32.0, %v3051_v7  ;;  %vm1178_vm2 = vweird.f32 %v3051_v7  ;;  %1257 = vmatpush.msra.mxu0 %v1228_v32  ;;  %v3041_v56 = vld [vmem:[%s923_s8] ss:$0 sm:$0xff]  ;;  %s3559_s8 = smov 120   ;;  %v4028_v29 = vld [vmem:[%s4387_s7 + $0x8] sm:$0xff] }
  0x7b   : > { %1288 = vmatpush.msra.mxu1 %v1265_v33  ;;  %1319 = vmatpush.msra.mxu2 %v1296_v34  ;;  %v3960_v63 = vld [vmem:[#allocation6] sm:$0xff] }
  0x7c   : > { %v1175_v9 = vsub.f32 1.0, %v1174_v8  ;;  %1352 = vmatpush.msrb.mxu0 %v3960_v63  ;;  %2901 = vmatpush.msra.mxu3 %v3960_v63  ;;  %v3042_v0 = vld [vmem:[%s932_s13] ss:$0 sm:$0xff] }
  0x7d   : > { %1387 = vmatpush.msrb.mxu1 %v3960_v63  ;;  %v3043_v1 = vld [vmem:[%s941_s6] ss:$0 sm:$0xff]  ;;  %s3562_s6 = smov 104  }
  0x7e   : > { %v1176_v10 = vmul.f32 %v3051_v7, %v1175_v9  ;;  %v3044_v8 = vld [vmem:[%s950_s10] ss:$0 sm:$0xff]  ;;  %s3563_s10 = smov 16  }
  0x80   : > { %v1177_v11 = vadd.f32 %v3051_v7, %v1176_v10 }
  0x82   : > { %v3923_v12 = vsel %vm1178_vm2, %v3051_v7, %v1177_v11 }
  0xec   : > { %v1169_v14 = vpop.xlane.xlu0 %1168 }
  0xed   : > { %v1172_v13 = vpop.xlane.xlu1 %1171  ;;  %v1180_v16 = vmul.f32 %v3923_v12, %v1169_v14 }
  0xee   : > { %v1181_v15 = vmul.f32 %v3923_v12, %v1172_v13 }
  0xef   : > { %v1182_v18 = vsub.f32 %v3917_v3, %v1180_v16  ;;  %v3995_v16 = vld [vmem:[%s4386_s22] sm:$0xff] }
  0xf0   : > { %v3928_v17 = vsub.f32 %v3915_v2, %v1181_v15 }
  0xf1   : > { %v1184_v20 = vmul.f32 %v1182_v18, %v1182_v18 }
  0xf2   : > { %v1185_v19 = vmul.f32 %v3928_v17, %v3928_v17 }
  0xf3   : > { %v1186_v22 = vsel %vm1166_vm1, %v1184_v20, 0.0 }
  0xf4   : > { %v1189_v21 = vsel %vm1166_vm1, %v1185_v19, 0.0  ;;  %1187 = vadd.xlane.f32.xlu0 %v1186_v22 }
  0xf5   : > { %1190 = vadd.xlane.f32.xlu1 %v1189_v21 }
 0x167   : > { %v1188_v36 = vpop.xlane.xlu0 %1187 }
 0x168   : > { %v1191_v35 = vpop.xlane.xlu1 %1190  ;;  %v1192_v38 = vmul.f32 %v1188_v36, %v3923_v12 }
 0x169   : > { %v1193_v37 = vmul.f32 %v1191_v35, %v3923_v12 }
 0x16a   : > { %v1194_v40 = vadd.f32 1e-05, %v1192_v38 }
 0x16b   : > { %v1195_v39 = vadd.f32 1e-05, %v1193_v37 }
 0x16c   : > { %vm1202_vm7 = vweird.f32 %v1194_v40 }
 0x16d   : > { %3052 = vrsqrt.f32 %v1195_v39  ;;  %vm1212_vm3 = vweird.f32 %v1195_v39 }
 0x16e   : > { %3054 = vrsqrt.f32 %v1194_v40 }
 0x173   : > { %v3053_v41 = vpop.eup %3052 }
 0x174   : > { %v3055_v42 = vpop.eup %3054  ;;  %v1207_v43 = vmul.f32 %v3053_v41, %v1195_v39  ;;  %vm1213_vm4 = vweird.f32 %v3053_v41 }
 0x175   : > { %v1197_v44 = vmul.f32 %v3055_v42, %v1194_v40  ;;  %vm1203_vm5 = vweird.f32 %v3055_v42  ;;  %vm1214_vm6 = vmor %vm1212_vm3, %vm1213_vm4 }
 0x176   : > { %v1208_v45 = vmul.f32 %v3053_v41, %v1207_v43  ;;  %vm1204_vm8 = vmor %vm1202_vm7, %vm1203_vm5 }
 0x177   : > { %v1198_v46 = vmul.f32 %v3055_v42, %v1197_v44 }
 0x178   : > { %v1209_v47 = vmul.f32 0.5, %v1208_v45 }
 0x179   : > { %v1199_v48 = vmul.f32 0.5, %v1198_v46 }
 0x17a   : > { %v1210_v49 = vsub.f32 1.5, %v1209_v47 }
 0x17b   : > { %v1200_v50 = vsub.f32 1.5, %v1199_v48 }
 0x17c   : > { %v1211_v51 = vmul.f32 %v3053_v41, %v1210_v49 }
 0x17d   : > { %v1201_v52 = vmul.f32 %v3055_v42, %v1200_v50 }
 0x17e   : > { %v1215_v57 = vsel %vm1214_vm6, %v3053_v41, %v1211_v51 }
 0x17f   : > { %v1205_v54 = vsel %vm1204_vm8, %v3055_v42, %v1201_v52  ;;  %v1217_v60 = vmul.f32 %v1215_v57, %v3928_v17  ;;  %v4007_v17 = vld [vmem:[%s4387_s7] sm:$0xff] }
 0x180   : > { %v1216_v55 = vmul.f32 %v1205_v54, %v1182_v18 }
 0x181   : > { %v1222_v61 = vmul.f32 %v3040_v53, %v1217_v60 }
 0x182   : > { %v1221_v58 = vmul.f32 %v3040_v53, %v1216_v55 }
 0x183   : > { %v1227_v62 = vadd.f32 %v3041_v56, %v1222_v61 }
 0x184   : > { %v1226_v59 = vadd.f32 %v3041_v56, %v1221_v58 }
 0x186   : > { %2840 = vmatmul.msk.f32.vlgmr.msra.gmra.mxu0 %vm1166_vm1, %v1226_v59  ;;  %2842 = vmatmul.msk.f32.vlgmr.msra.gmra.mxu1 %vm1166_vm1, %v1226_v59 }
 0x187   : > { %2844 = vmatmul.msk.f32.vlgmr.msra.gmra.mxu2 %vm1166_vm1, %v1226_v59 }
 0x18e   : > { %2841 = vmatmul.msk.f32.gmra.mxu0 %vm1166_vm1, %v1227_v62  ;;  %2843 = vmatmul.msk.f32.gmra.mxu1 %vm1166_vm1, %v1227_v62 }
 0x18f   : > { %2845 = vmatmul.msk.f32.gmra.mxu2 %vm1166_vm1, %v1227_v62 }
 0x203   : > { %v1259_v4 = vpop.f32.mrf.mxu0  ;;  %v1290_v5 = vpop.f32.mrf.mxu1 }
 0x204   : > { %v3969_v6 = vadd.f32 %v3042_v0, %v1259_v4  ;;  %v3971_v7 = vadd.f32 %v3043_v1, %v1290_v5 }
 0x206   : > { %2848 = vmatmul.msk.f32.vlgmr.msrb.gmra.mxu1 %vm1330_vm9, %v3971_v7  ;;  %1530 = vrot.lane.b32.xlu0 %v3969_v6, %s3559_s8  ;;  %v1364_v21 = vmul.f32 %v3971_v7, %v3995_v16  ;;  %v1327_v26 = vmul.f32 %v3969_v6, %v3995_v16 }
 0x207   : > { %2846 = vmatmul.msk.f32.vlgmr.msrb.gmra.mxu0 %vm1330_vm9, %v3969_v6 }
 0x20a   : > { %v1321_v9 = vpop.f32.mrf.mxu2 }
 0x20b   : > { %v3981_v10 = vadd.f32 %v3044_v8, %v1321_v9  ;;  %v1262_v11 = vpop.f32.mrf.mxu0  ;;  %v1293_v13 = vpop.f32.mrf.mxu1 }
 0x20c   : > { %v3983_v14 = vadd.f32 %v3042_v0, %v1262_v11  ;;  %v3985_v15 = vadd.f32 %v3043_v1, %v1293_v13 }
 0x20d   : > { %1487 = vmatpush.msrb.mxu2 %v3981_v10 }
 0x20e   : > { %1577 = vrot.lane.b32.xlu1 %v3985_v15, %s3559_s8  ;;  %2849 = vmatmul.msk.f32.vlgmr.msra.gmra.mxu3 %vm1330_vm9, %v3985_v15  ;;  %v1365_v32 = vmul.f32 %v3985_v15, %v4023_v28  ;;  %v1328_v36 = vmul.f32 %v3983_v14, %v4023_v28 }
 0x20f   : > { %1521 = vrot.lane.b32.xlu0 %v3995_v16, %s3560_s1  ;;  %2847 = vmatmul.msk.f32.gmra.mxu0 %vm1330_vm9, %v3983_v14 }
 0x210   : > { %1598 = vmatpush.msra.mxu2 %v3960_v63 }
 0x212   : > { %v1324_v19 = vpop.f32.mrf.mxu2 }
 0x213   : > { %v4013_v25 = vadd.f32 %v3044_v8, %v1324_v19 }
 0x217   : > { %1808 = vrot.lane.b32.xlu0 %v3971_v7, %s3561_s25 }
 0x278   : > { %v1531_v38 = vpop.permute.xlu0 %1530 }
 0x280   : > { %v1578_v51 = vpop.permute.xlu1 %1577 }
 0x281   : > { %v1522_v50 = vpop.permute.xlu0 %1521 }
 0x282   : > { %v1527_v60 = vmul.f32 %v1522_v50, %v3969_v6  ;;  %v1573_v0 = vmul.f32 %v1522_v50, %v3971_v7 }
 0x283   : > { %v1389_v18 = vpop.f32.mrf.mxu1 }
 0x284   : > { %v1354_v20 = vpop.f32.mrf.mxu0  ;;  %v1395_v22 = vmul.f32 %v1389_v18, %v4007_v17 }
 0x285   : > { %v1360_v23 = vmul.f32 %v1354_v20, %v4007_v17 }
 0x286   : > { %v1397_v24 = vadd.f32 %v1395_v22, %v1364_v21 }
 0x287   : > { %v1362_v27 = vadd.f32 %v1360_v23, %v1327_v26 }
 0x288   : > { %2850 = vmatpush.xpose.msk.msra.mxu0 %vm1330_vm9, %v1397_v24 }
 0x289   : > { %v1809_v52 = vpop.permute.xlu0 %1808 }
 0x28b   : > { %2851 = vmatmul.msk.f32.vlgmr.msra.gmra.mxu0 %vm1330_vm9, %v1362_v27 }
 0x28c   : > { %1510 = vmatpush.msrb.mxu0 %v4013_v25  ;;  %v1357_v30 = vpop.f32.mrf.mxu0 }
 0x28d   : > { %v1361_v34 = vmul.f32 %v1357_v30, %v4028_v29 }
 0x28f   : > { %v1363_v37 = vadd.f32 %v1361_v34, %v1328_v36 }
 0x291   : > { %v1392_v31 = vpop.f32.mrf.mxu3 }
 0x292   : > { %v1396_v33 = vmul.f32 %v1392_v31, %v4028_v29 }
 0x294   : > { %v1398_v35 = vadd.f32 %v1396_v33, %v1365_v32 }
 0x296   : > { %2852 = vmatpush.xpose.msk.msra.mxu1 %vm1330_vm9, %v1398_v35 }
 0x299   : > { %2853 = vmatmul.msk.f32.vlgmr.msra.gmra.mxu1 %vm1330_vm9, %v1363_v37 }
 0x29a   : > { %1553 = vmatpush.msrb.mxu1 %v3960_v63 }
 0x29c   : > { %1786 = vmatpush.msra.mxu1 %v3960_v63 }
 0x2a1   : > { %2856 = vmatmul.msk.f32.vlgmr.msrb.gmra.mxu1 %vm1330_vm9, %v1531_v38 }
 0x2a2   : > { %2017 = vmatpush.msrb.mxu1 %v3960_v63 }
 0x308   : > { %v1422_v39 = vpop.f32.mrf.mxu0 }
 0x309   : > { %v1451_v40 = vsel %vm1330_vm9, %v1422_v39, -inf }
 0x30a   : > { %1452 = vmax.xlane.f32.xlu2 %v1451_v40 }
 0x316   : > { %v4043_v41 = vpop.f32.mrf.mxu1 }
 0x31e   : > { %v1555_v42 = vpop.f32.mrf.mxu1 }
 0x31f   : > { %v1561_v43 = vmul.f32 %v1555_v42, %v4007_v17 }
 0x321   : > { %1565 = vrot.lane.b32.xlu1 %v1561_v43, %s3560_s1 }
 0x322   : > { %1575 = vrot.lane.b32.xlu2 %v3971_v7, %s3559_s8 }
 0x329   : > { %1523 = vrot.lane.b32.xlu1 %v4023_v28, %s3560_s1 }
 0x32a   : > { %1532 = vrot.lane.b32.xlu2 %v3983_v14, %s3559_s8 }
 0x37d   : > { %v1453_v44 = vpop.xlane.xlu2 %1452 }
 0x37e   : > { %v1457_v45 = vsub.f32 %v1422_v39, %v1453_v44 }
 0x380   : > { %v1459_v46 = vmul.f32 1.442695, %v1457_v45 }
 0x382   : > { %3056 = vpow2.f32 %v1459_v46 }
 0x385   : > { %v1576_v47 = vpop.permute.xlu2 %1575 }
 0x388   : > { %v4053_v48 = vpop.eup %3056 }
 0x389   : > { %2854 = vmatmul.msk.f32.vlgmr.msrb.gmra.mxu2 %vm1330_vm9, %v4053_v48 }
 0x38a   : > { %1831 = vmatpush.msrb.mxu2 %v3960_v63 }
 0x38d   : > { %v1533_v49 = vpop.permute.xlu2 %1532 }
 0x38e   : > { %2857 = vmatmul.msk.f32.gmra.mxu1 %vm1330_vm9, %v1533_v49 }
 0x391   : > { %2858 = vmatmul.msk.f32.vlgmr.msra.gmra.mxu2 %vm1330_vm9, %v1576_v47 }
 0x392   : > { %2062 = vmatpush.msra.mxu2 %v3960_v63  ;;  %v1454_v63 = vsel %vm1330_vm9, %v4043_v41, -inf }
 0x393   : > { %v1566_v58 = vpop.permute.xlu1 %1565 }
 0x394   : > { %v1571_v61 = vadd.f32 %v1566_v58, %v1527_v60 }
 0x399   : > { %2859 = vmatmul.msk.f32.gmra.mxu2 %vm1330_vm9, %v1578_v51 }
 0x39b   : > { %v1524_v8 = vpop.permute.xlu1 %1523 }
 0x39c   : > { %v1528_v9 = vmul.f32 %v1524_v8, %v3983_v14  ;;  %v1574_v21 = vmul.f32 %v1524_v8, %v3985_v15 }
 0x3a1   : > { %2868 = vmatmul.msk.f32.vlgmr.msrb.gmra.mxu2 %vm1330_vm9, %v1809_v52 }
 0x40b   : > { %v1558_v59 = vpop.f32.mrf.mxu1 }
 0x40c   : > { %v4063_v53 = vpop.f32.mrf.mxu2  ;;  %v1562_v62 = vmul.f32 %v1558_v59, %v4028_v29 }
 0x414   : > { %v1600_v54 = vpop.f32.mrf.mxu2 }
 0x415   : > { %v1606_v55 = vmul.f32 %v1600_v54, %v4007_v17 }
 0x417   : > { %1610 = vrot.lane.b32.xlu2 %v1606_v55, %s3560_s1 }
 0x41c   : > { %v1603_v56 = vpop.f32.mrf.mxu2 }
 0x41d   : > { %v1607_v57 = vmul.f32 %v1603_v56, %v4028_v29 }
 0x41f   : > { %1763 = vrot.lane.b32.xlu2 %v3969_v6, %s3561_s25  ;;  %1612 = vrot.lane.b32.xlu0 %v1607_v57, %s3560_s1 }
 0x424   : > { %v1833_v18 = vpop.f32.mrf.mxu2 }
 0x425   : > { %v1839_v20 = vmul.f32 %v1833_v18, %v4007_v17 }
 0x427   : > { %1619 = vrot.lane.b32.xlu0 %v1571_v61, %s3559_s8  ;;  %1567 = vrot.lane.b32.xlu2 %v1562_v62, %s3560_s1 }
 0x42f   : > { %1810 = vrot.lane.b32.xlu2 %v3985_v15, %s3561_s25 }
 0x451   : > { %1455 = vmax.xlane.f32.xlu0 %v1454_v63 }
 0x465   : > { %1994 = vrot.lane.b32.xlu0 %v3969_v6, %s3562_s6 }
 0x471   : > { %v1611_v1 = vpop.permute.xlu2 %1610 }
 0x472   : > { %v1616_v4 = vadd.f32 %v1611_v1, %v1573_v0 }
 0x474   : > { %1622 = vrot.lane.b32.xlu1 %v1616_v4, %s3559_s8 }
 0x479   : > { %v1764_v5 = vpop.permute.xlu2 %1763 }
 0x47a   : > { %2866 = vmatmul.msk.f32.vlgmr.msra.gmra.mxu1 %vm1330_vm9, %v1764_v5 }
 0x47c   : > { %1765 = vrot.lane.b32.xlu1 %v3983_v14, %s3561_s25 }
 0x481   : > { %v1568_v11 = vpop.permute.xlu2 %1567 }
 0x482   : > { %v1572_v13 = vadd.f32 %v1568_v11, %v1528_v9 }
 0x484   : > { %1649 = vrot.lane.b32.xlu1 %v1572_v13, %s3559_s8 }
 0x489   : > { %v1811_v19 = vpop.permute.xlu2 %1810 }
 0x48a   : > { %2869 = vmatmul.msk.f32.gmra.mxu2 %vm1330_vm9, %v1811_v19 }
 0x48c   : > { %1843 = vrot.lane.b32.xlu1 %v1839_v20, %s3563_s10 }
 0x491   : > { %v1613_v22 = vpop.permute.xlu0 %1612 }
 0x492   : > { %v1617_v23 = vadd.f32 %v1613_v22, %v1574_v21 }
 0x494   : > { %1652 = vrot.lane.b32.xlu2 %v1617_v23, %s3559_s8  ;;  %2039 = vrot.lane.b32.xlu1 %v3971_v7, %s3562_s6 }
 0x499   : > { %v1620_v24 = vpop.permute.xlu0 %1619 }
 0x49c   : > { %1754 = vrot.lane.b32.xlu2 %v3995_v16, %s3563_s10  ;;  %1756 = vrot.lane.b32.xlu1 %v4023_v28, %s3563_s10 }
 0x4c4   : > { %v1456_v26 = vpop.xlane.xlu0 %1455 }
 0x4c5   : > { %v1458_v27 = vsub.f32 %v4043_v41, %v1456_v26 }
 0x4c7   : > { %v1461_v30 = vmul.f32 1.442695, %v1458_v27 }
 0x4c9   : > { %3058 = vpow2.f32 %v1461_v30 }
 0x4cf   : > { %v4100_v31 = vpop.eup %3058 }
 0x4d0   : > { %2855 = vmatmul.msk.f32.vlgmr.msrb.gmra.mxu0 %vm1330_vm9, %v4100_v31 }
 0x4d7   : > { %v1995_v35 = vpop.permute.xlu0 %1994 }
 0x4e6   : > { %v1623_v32 = vpop.permute.xlu1 %1622 }
 0x4e7   : > { %2860 = vmatpush.xpose.msk.msrb.mxu3 %vm1330_vm9, %v1623_v32 }
 0x4ea   : > { %2861 = vmatmul.msk.f32.vlgmr.msrb.gmra.mxu3 %vm1330_vm9, %v1620_v24 }
 0x4ee   : > { %v1766_v33 = vpop.permute.xlu1 %1765  ;;  %v1653_v34 = vpop.permute.xlu2 %1652 }
 0x4ef   : > { %2862 = vmatpush.xpose.msk.msra.mxu0 %vm1330_vm9, %v1653_v34  ;;  %2867 = vmatmul.msk.f32.gmra.mxu1 %vm1330_vm9, %v1766_v33 }
 0x4f6   : > { %v1650_v36 = vpop.permute.xlu1 %1649  ;;  %v1755_v39 = vpop.permute.xlu2 %1754 }
 0x4f7   : > { %2863 = vmatmul.msk.f32.vlgmr.msra.gmra.mxu0 %vm1330_vm9, %v1650_v36  ;;  %v1788_v37 = vpop.f32.mrf.mxu1  ;;  %2876 = vmatmul.msk.f32.vlgmr.msrb.gmra.mxu1 %vm1330_vm9, %v1995_v35  ;;  %v1806_v40 = vmul.f32 %v1755_v39, %v3971_v7  ;;  %v1760_v56 = vmul.f32 %v1755_v39, %v3969_v6 }
 0x4f8   : > { %v1794_v38 = vmul.f32 %v1788_v37, %v4007_v17 }
 0x4fa   : > { %1798 = vrot.lane.b32.xlu2 %v1794_v38, %s3563_s10 }
 0x4fe   : > { %v1844_v41 = vpop.permute.xlu1 %1843 }
 0x4ff   : > { %v1849_v42 = vadd.f32 %v1844_v41, %v1806_v40 }
 0x501   : > { %1855 = vrot.lane.b32.xlu0 %v1849_v42, %s3561_s25 }
 0x506   : > { %v2040_v43 = vpop.permute.xlu1 %2039 }
 0x507   : > { %2878 = vmatmul.msk.f32.vlgmr.msra.gmra.mxu2 %vm1330_vm9, %v2040_v43 }
 0x50d   : > { %v1836_v44 = vpop.f32.mrf.mxu2 }
 0x50e   : > { %v1840_v45 = vmul.f32 %v1836_v44, %v4028_v29  ;;  %v1757_v58 = vpop.permute.xlu1 %1756 }
 0x50f   : > { %v1807_v61 = vmul.f32 %v1757_v58, %v3985_v15  ;;  %v1761_v0 = vmul.f32 %v1757_v58, %v3983_v14 }
 0x510   : > { %1845 = vrot.lane.b32.xlu1 %v1840_v45, %s3563_s10 }
 0x54d   : > { %v4117_v46 = vpop.f32.mrf.mxu0 }
 0x554   : > { %v1799_v55 = vpop.permute.xlu2 %1798 }
 0x555   : > { %v1804_v57 = vadd.f32 %v1799_v55, %v1760_v56 }
 0x56c   : > { %v1791_v47 = vpop.f32.mrf.mxu1 }
 0x56d   : > { %v1795_v49 = vmul.f32 %v1791_v47, %v4028_v29  ;;  %v1645_v50 = vpop.f32.mrf.mxu3 }
 0x56e   : > { %v1678_v51 = vsel %vm1330_vm9, %v1645_v50, -inf }
 0x56f   : > { %1679 = vmax.xlane.f32.xlu2 %v1678_v51  ;;  %1800 = vrot.lane.b32.xlu1 %v1795_v49, %s3563_s10 }
 0x573   : > { %v1856_v11 = vpop.permute.xlu0 %1855 }
 0x574   : > { %v1675_v52 = vpop.f32.mrf.mxu0  ;;  %v2019_v59 = vpop.f32.mrf.mxu1 }
 0x575   : > { %v1681_v54 = vsel %vm1330_vm9, %v1675_v52, -inf  ;;  %v2025_v62 = vmul.f32 %v2019_v59, %v4007_v17 }
 0x576   : > { %1682 = vmax.xlane.f32.xlu0 %v1681_v54 }
 0x577   : > { %1697 = vrot.lane.b32.xlu1 %v3981_v10, %s3559_s8 }
 0x57f   : > { %2041 = vrot.lane.b32.xlu1 %v3985_v15, %s3562_s6 }
 0x582   : > { %v1846_v60 = vpop.permute.xlu1 %1845 }
 0x583   : > { %v1850_v63 = vadd.f32 %v1846_v60, %v1807_v61 }
 0x587   : > { %1996 = vrot.lane.b32.xlu2 %v3983_v14, %s3562_s6  ;;  %1852 = vrot.lane.b32.xlu1 %v1804_v57, %s3561_s25 }
 0x58a   : > { %v2064_v9 = vpop.f32.mrf.mxu2 }
 0x58b   : > { %v2070_v18 = vmul.f32 %v2064_v9, %v4007_v17 }
 0x58f   : > { %1985 = vrot.lane.b32.xlu2 %v3995_v16, %s3564_s11  ;;  %1724 = vrot.lane.b32.xlu1 %v4013_v25, %s3559_s8 }
 0x597   : > { %2029 = vrot.lane.b32.xlu2 %v2025_v62, %s3564_s11  ;;  %1885 = vrot.lane.b32.xlu1 %v1850_v63, %s3561_s25 }
 0x5e1   : > { %v1801_v1 = vpop.permute.xlu1 %1800 }
 0x5e2   : > { %v1805_v4 = vadd.f32 %v1801_v1, %v1761_v0  ;;  %v1680_v5 = vpop.xlane.xlu2 %1679 }
 0x5e3   : > { %v1684_v16 = vsub.f32 %v1645_v50, %v1680_v5 }
 0x5e4   : > { %1882 = vrot.lane.b32.xlu1 %v1805_v4, %s3561_s25 }
 0x5e5   : > { %v1686_v8 = vmul.f32 1.442695, %v1684_v16 }
 0x5e7   : > { %3060 = vpow2.f32 %v1686_v8 }
 0x5e9   : > { %v1698_v13 = vpop.permute.xlu1 %1697  ;;  %v1683_v21 = vpop.xlane.xlu0 %1682 }
 0x5ea   : > { %1718 = vmatpush.msra.mxu3 %v1698_v13  ;;  %v1997_v19 = vpop.permute.xlu2 %1996  ;;  %v1685_v23 = vsub.f32 %v1675_v52, %v1683_v21 }
 0x5eb   : > { %2877 = vmatmul.msk.f32.gmra.mxu1 %vm1330_vm9, %v1997_v19 }
 0x5ec   : > { %2870 = vmatpush.xpose.msk.msrb.mxu3 %vm1330_vm9, %v1856_v11  ;;  %2074 = vrot.lane.b32.xlu1 %v2070_v18, %s3564_s11  ;;  %v1688_v17 = vmul.f32 1.442695, %v1685_v23  ;;  %v1463_v23 = vsel %vm1330_vm9, %v4053_v48, 0.0 }
 0x5ed   : > { %v3061_v20 = vpop.eup %3060 }
 0x5ee   : > { %2864 = vmatmul.msk.f32.vlgmr.msra.gmra.mxu3 %vm1330_vm9, %v3061_v20  ;;  %3062 = vpow2.f32 %v1688_v17  ;;  %v1690_v56 = vsel %vm1330_vm9, %v3061_v20, 0.0 }
 0x5f1   : > { %v2042_v22 = vpop.permute.xlu1 %2041 }
 0x5f2   : > { %2879 = vmatmul.msk.f32.gmra.mxu2 %vm1330_vm9, %v2042_v22  ;;  %v1986_v39 = vpop.permute.xlu2 %1985 }
 0x5f3   : > { %v2037_v41 = vmul.f32 %v1986_v39, %v3971_v7  ;;  %v1991_v44 = vmul.f32 %v1986_v39, %v3969_v6 }
 0x5f4   : > { %1987 = vrot.lane.b32.xlu1 %v4023_v28, %s3564_s11  ;;  %v3063_v27 = vpop.eup %3062 }
 0x5f5   : > { %v1693_v58 = vsel %vm1330_vm9, %v3063_v27, 0.0 }
 0x5f9   : > { %v1853_v24 = vpop.permute.xlu1 %1852 }
 0x5fa   : > { %2871 = vmatmul.msk.f32.vlgmr.msrb.gmra.mxu3 %vm1330_vm9, %v1853_v24  ;;  %v2030_v43 = vpop.permute.xlu2 %2029 }
 0x601   : > { %v1725_v26 = vpop.permute.xlu1 %1724 }
 0x602   : > { %1745 = vmatpush.msrb.mxu0 %v1725_v26 }
 0x603   : > { %2865 = vmatmul.msk.f32.vlgmr.msrb.gmra.mxu0 %vm1330_vm9, %v3063_v27 }
 0x609   : > { %v1886_v30 = vpop.permute.xlu1 %1885 }
 0x60a   : > { %2872 = vmatpush.xpose.msk.msra.mxu0 %vm1330_vm9, %v1886_v30 }
 0x656   : > { %v1883_v32 = vpop.permute.xlu1 %1882 }
 0x657   : > { %2873 = vmatmul.msk.f32.vlgmr.msra.gmra.mxu0 %vm1330_vm9, %v1883_v32 }
 0x65e   : > { %v2075_v40 = vpop.permute.xlu1 %2074 }
 0x65f   : > { %v2080_v42 = vadd.f32 %v2075_v40, %v2037_v41 }
 0x666   : > { %v1988_v47 = vpop.permute.xlu1 %1987 }
 0x667   : > { %v2038_v49 = vmul.f32 %v1988_v47, %v3985_v15  ;;  %v1992_v54 = vmul.f32 %v1988_v47, %v3983_v14 }
 0x668   : > { %v2022_v33 = vpop.f32.mrf.mxu1 }
 0x669   : > { %v2026_v34 = vmul.f32 %v2022_v33, %v4028_v29 }
 0x66b   : > { %2031 = vrot.lane.b32.xlu0 %v2026_v34, %s3564_s11 }
 0x671   : > { %v4155_v28 = vpop.f32.mrf.mxu3 }
 0x675   : > { %v2067_v35 = vpop.f32.mrf.mxu2 }
 0x676   : > { %v2071_v36 = vmul.f32 %v2067_v35, %v4028_v29  ;;  %v2035_v29 = vadd.f32 %v2030_v43, %v1991_v44 }
 0x678   : > { %2076 = vrot.lane.b32.xlu2 %v2071_v36, %s3564_s11 }
 0x67d   : > { %v1878_v37 = vpop.f32.mrf.mxu3 }
 0x67e   : > { %v1911_v38 = vsel %vm1330_vm9, %v1878_v37, -inf }
 0x67f   : > { %1912 = vmax.xlane.f32.xlu1 %v1911_v38 }
 0x680   : > { %1929 = vrot.lane.b32.xlu2 %v3981_v10, %s3561_s25  ;;  %v4168_v45 = vpop.f32.mrf.mxu0 }
 0x688   : > { %2086 = vrot.lane.b32.xlu2 %v2080_v42, %s3562_s6 }
 0x690   : > { %2083 = vrot.lane.b32.xlu2 %v2035_v29, %s3562_s6 }
 0x698   : > { %1955 = vrot.lane.b32.xlu2 %v4013_v25, %s3561_s25 }
 0x6d2   : > { %v2077_v50 = vpop.permute.xlu2 %2076 }
 0x6d3   : > { %v2081_v51 = vadd.f32 %v2077_v50, %v2038_v49 }
 0x6d4   : > { %v1908_v7 = vpop.f32.mrf.mxu0 }
 0x6d5   : > { %2116 = vrot.lane.b32.xlu2 %v2081_v51, %s3562_s6  ;;  %v1914_v52 = vsel %vm1330_vm9, %v1908_v7, -inf }
 0x6d6   : > { %1915 = vmax.xlane.f32.xlu0 %v1914_v52  ;;  %v2250_v52 = vld [vmem:[%s3893_s2 + $0x10] sm:$0xff] }
 0x6da   : > { %v1930_v6 = vpop.permute.xlu2 %1929 }
 0x6db   : > { %1950 = vmatpush.msra.mxu3 %v1930_v6  ;;  %v2249_v6 = vld [vmem:[%s3893_s2 + $0x8] sm:$0xff] }
 0x6dd   : > { %v2032_v55 = vpop.permute.xlu0 %2031 }
 0x6de   : > { %v2036_v57 = vadd.f32 %v2032_v55, %v1992_v54  ;;  %1691 = vadd.xlane.f32.xlu0 %v1690_v56  ;;  %v2248_v54 = vld [vmem:[%s3893_s2] sm:$0xff] }
 0x6e0   : > { %2113 = vrot.lane.b32.xlu2 %v2036_v57, %s3562_s6 }
 0x6e2   : > { %v2087_v15 = vpop.permute.xlu2 %2086 }
 0x6e3   : > { %2880 = vmatpush.xpose.msk.msrb.mxu3 %vm1330_vm9, %v2087_v15 }
 0x6e6   : > { %1694 = vadd.xlane.f32.xlu0 %v1693_v58 }
 0x6e8   : > { %2160 = vrot.lane.b32.xlu2 %v3981_v10, %s3562_s6 }
 0x6ea   : > { %v2084_v59 = vpop.permute.xlu2 %2083 }
 0x6f0   : > { %2186 = vrot.lane.b32.xlu2 %v4013_v25, %s3562_s6 }
 0x6f2   : > { %v1913_v14 = vpop.xlane.xlu1 %1912  ;;  %v1956_v60 = vpop.permute.xlu2 %1955 }
 0x6f3   : > { %v1917_v61 = vsub.f32 %v1878_v37, %v1913_v14  ;;  %1976 = vmatpush.msrb.mxu0 %v1956_v60 }
 0x6f5   : > { %v1919_v62 = vmul.f32 1.442695, %v1917_v61 }
 0x6f7   : > { %3064 = vpow2.f32 %v1919_v62 }
 0x6fd   : > { %v3065_v63 = vpop.eup %3064 }
 0x6fe   : > { %2874 = vmatmul.msk.f32.vlgmr.msra.gmra.mxu3 %vm1330_vm9, %v3065_v63  ;;  %v1923_v21 = vsel %vm1330_vm9, %v3065_v63, 0.0 }
 0x706   : > { %2881 = vmatmul.msk.f32.vlgmr.msrb.gmra.mxu3 %vm1330_vm9, %v2084_v59 }
 0x72f   : > { %v2117_v0 = vpop.permute.xlu2 %2116 }
 0x730   : > { %2882 = vmatpush.xpose.msk.msra.mxu0 %vm1330_vm9, %v2117_v0 }
 0x73a   : > { %v2114_v1 = vpop.permute.xlu2 %2113 }
 0x742   : > { %v2161_v10 = vpop.permute.xlu2 %2160 }
 0x743   : > { %2181 = vmatpush.msra.mxu3 %v2161_v10 }
 0x749   : > { %v1916_v4 = vpop.xlane.xlu0 %1915 }
 0x74a   : > { %v1918_v5 = vsub.f32 %v1908_v7, %v1916_v4  ;;  %v2187_v8 = vpop.permute.xlu2 %2186  ;;  %v2251_v7 = vld [vmem:[%s3893_s2 + $0x18] sm:$0xff] }
 0x74b   : > { %2270 = vmatpush.msra.mxu1 %v2251_v7 }
 0x74c   : > { %v1921_v25 = vmul.f32 1.442695, %v1918_v5 }
 0x74d   : > { %2271 = vmatpush.msra.mxu1 %v2250_v52  ;;  %v2415_v52 = vld [vmem:[%s3903_s29 + $0x78] sm:$0xff] }
 0x74e   : > { %3066 = vpow2.f32 %v1921_v25  ;;  %2416 = vmatpush.msrb.mxu3 %v2415_v52 }
 0x74f   : > { %2272 = vmatpush.msra.mxu1 %v2249_v6  ;;  %v2414_v6 = vld [vmem:[%s3903_s29 + $0x70] sm:$0xff] }
 0x750   : > { %2417 = vmatpush.msrb.mxu3 %v2414_v6 }
 0x751   : > { %v1692_v17 = vpop.xlane.xlu0 %1691  ;;  %2273 = vmatpush.msra.mxu1 %v2248_v54  ;;  %v2413_v54 = vld [vmem:[%s3903_s29 + $0x68] sm:$0xff] }
 0x752   : > { %3068 = vrcp.f32 %v1692_v17  ;;  %2418 = vmatpush.msrb.mxu3 %v2413_v54 }
 0x754   : > { %v3067_v16 = vpop.eup %3066 }
 0x755   : > { %2875 = vmatmul.msk.f32.vlgmr.msrb.gmra.mxu0 %vm1330_vm9, %v3067_v16  ;;  %v1926_v22 = vsel %vm1330_vm9, %v3067_v16, 0.0 }
 0x756   : > { %2207 = vmatpush.msrb.mxu0 %v2187_v8 }
 0x758   : > { %v3069_v32 = vpop.eup %3068 }
 0x759   : > { %v1695_v30 = vpop.xlane.xlu0 %1694  ;;  %v1752_v35 = vmul.f32 %v3069_v32, %v4155_v28  ;;  %v1466_v28 = vsel %vm1330_vm9, %v4100_v31, 0.0 }
 0x75d   : > { %2883 = vmatmul.msk.f32.vlgmr.msra.gmra.mxu0 %vm1330_vm9, %v2114_v1 }
 0x781   : > { %v1952_v9 = vpop.f32.mrf.mxu3 }
 0x789   : > { %v2109_v11 = vpop.f32.mrf.mxu3 }
 0x78a   : > { %v2142_v13 = vsel %vm1330_vm9, %v2109_v11, -inf }
 0x78b   : > { %2143 = vmax.xlane.f32.xlu1 %v2142_v13  ;;  %v3045_v13 = vld [vmem:[%s959_s12] ss:$0 sm:$0xff] }
 0x7d2   : > { %v1978_v18 = vpop.f32.mrf.mxu0 }
 0x7da   : > { %v2139_v19 = vpop.f32.mrf.mxu0 }
 0x7db   : > { %v2145_v20 = vsel %vm1330_vm9, %v2139_v19, -inf }
 0x7dc   : > { %2146 = vmax.xlane.f32.xlu1 %v2145_v20 }
 0x7e4   : > { %1924 = vadd.xlane.f32.xlu1 %v1923_v21 }
 0x7ec   : > { %1927 = vadd.xlane.f32.xlu1 %v1926_v22 }
 0x7f4   : > { %1464 = vadd.xlane.f32.xlu1 %v1463_v23 }
 0x7fe   : > { %v2144_v24 = vpop.xlane.xlu1 %2143 }
 0x7ff   : > { %v2148_v26 = vsub.f32 %v2109_v11, %v2144_v24 }
 0x801   : > { %v2150_v27 = vmul.f32 1.442695, %v2148_v26 }
 0x803   : > { %3070 = vpow2.f32 %v2150_v27 }
 0x804   : > { %3072 = vrcp.f32 %v1695_v30 }
 0x809   : > { %v3071_v33 = vpop.eup %3070 }
 0x80a   : > { %2884 = vmatmul.msk.f32.vlgmr.msra.gmra.mxu3 %vm1330_vm9, %v3071_v33  ;;  %v2154_v34 = vsel %vm1330_vm9, %v3071_v33, 0.0  ;;  %v3073_v48 = vpop.eup %3072 }
 0x80b   : > { %2155 = vadd.xlane.f32.xlu2 %v2154_v34  ;;  %v1753_v36 = vmul.f32 %v3073_v48, %v4168_v45  ;;  %v2348_v48 = vld [vmem:[%s3898_s24 + $0x18] sm:$0xff] }
 0x80c   : > { %2371 = vmatpush.msrb.mxu2 %v2348_v48 }
 0x80d   : > { %2218 = vrot.lane.b32.xlu1 %v1752_v35, %s3560_s1 }
 0x815   : > { %2220 = vrot.lane.b32.xlu1 %v1753_v36, %s3560_s1  ;;  %v2347_v36 = vld [vmem:[%s3898_s24 + $0x10] sm:$0xff] }
 0x816   : > { %2372 = vmatpush.msrb.mxu2 %v2347_v36 }
 0x84f   : > { %v2147_v37 = vpop.xlane.xlu1 %2146 }
 0x850   : > { %v2149_v38 = vsub.f32 %v2139_v19, %v2147_v37  ;;  %v2346_v37 = vld [vmem:[%s3898_s24 + $0x8] sm:$0xff] }
 0x851   : > { %2373 = vmatpush.msrb.mxu2 %v2346_v37 }
 0x852   : > { %v2152_v39 = vmul.f32 1.442695, %v2149_v38  ;;  %v2345_v38 = vld [vmem:[%s3898_s24] sm:$0xff]  ;;  %s4389_s24 = sld [smem:[#allocation46_spill]] (!%p2890_p3) }
 0x853   : > { %2374 = vmatpush.msrb.mxu2 %v2345_v38 }
 0x854   : > { %3074 = vpow2.f32 %v2152_v39 }
 0x857   : > { %v1925_v42 = vpop.xlane.xlu1 %1924 }
 0x858   : > { %3076 = vrcp.f32 %v1925_v42 }
 0x85a   : > { %v3075_v40 = vpop.eup %3074 }
 0x85b   : > { %2885 = vmatmul.msk.f32.vlgmr.msrb.gmra.mxu0 %vm1330_vm9, %v3075_v40  ;;  %v2157_v41 = vsel %vm1330_vm9, %v3075_v40, 0.0 }
 0x85c   : > { %2158 = vadd.xlane.f32.xlu0 %v2157_v41 }
 0x85e   : > { %v3077_v44 = vpop.eup %3076 }
 0x85f   : > { %v1928_v43 = vpop.xlane.xlu1 %1927  ;;  %v1983_v29 = vmul.f32 %v3077_v44, %v1952_v9 }
 0x860   : > { %3078 = vrcp.f32 %v1928_v43 }
 0x864   : > { %1467 = vadd.xlane.f32.xlu0 %v1466_v28 }
 0x866   : > { %v3079_v45 = vpop.eup %3078 }
 0x867   : > { %v1984_v47 = vmul.f32 %v3079_v45, %v1978_v18  ;;  %v1465_v58 = vpop.xlane.xlu1 %1464 }
 0x878   : > { %2226 = vrot.lane.b32.xlu0 %v1983_v29, %s3563_s10 }
 0x87e   : > { %v2156_v49 = vpop.xlane.xlu2 %2155 }
 0x87f   : > { %3080 = vrcp.f32 %v2156_v49  ;;  %v2219_v60 = vpop.permute.xlu1 %2218 }
 0x880   : > { %2228 = vrot.lane.b32.xlu0 %v1984_v47, %s3563_s10  ;;  %v3046_v47 = vld [vmem:[%s968_s14] ss:$0 sm:$0xff] }
 0x885   : > { %v3081_v31 = vpop.eup %3080 }
 0x887   : > { %v2221_v25 = vpop.permute.xlu1 %2220 }
 0x88d   : > { %v2183_v50 = vpop.f32.mrf.mxu3 }
 0x88e   : > { %v2214_v51 = vmul.f32 %v3081_v31, %v2183_v50  ;;  %v3047_v50 = vld [vmem:[%s977_s15] ss:$0 sm:$0xff] }
 0x890   : > { %2234 = vrot.lane.b32.xlu2 %v2214_v51, %s3564_s11 }
 0x8cf   : > { %v2159_v55 = vpop.xlane.xlu0 %2158 }
 0x8d0   : > { %3082 = vrcp.f32 %v2159_v55 }
 0x8d1   : > { %3084 = vrcp.f32 %v1465_v58 }
 0x8d6   : > { %v3083_v56 = vpop.eup %3082 }
 0x8d7   : > { %v1468_v59 = vpop.xlane.xlu0 %1467  ;;  %v3085_v14 = vpop.eup %3084 }
 0x8d8   : > { %v2209_v57 = vpop.f32.mrf.mxu0  ;;  %3086 = vrcp.f32 %v1468_v59  ;;  %v1517_v61 = vmul.f32 %v3085_v14, %v4063_v53 }
 0x8d9   : > { %v2215_v15 = vmul.f32 %v3083_v56, %v2209_v57 }
 0x8da   : > { %v2240_v62 = vsel %vm1330_vm9, %v1517_v61, %v2219_v60 }
 0x8db   : > { %2236 = vrot.lane.b32.xlu1 %v2215_v15, %s3564_s11 }
 0x8de   : > { %v3087_v1 = vpop.eup %3086 }
 0x8df   : > { %v1518_v5 = vmul.f32 %v3087_v1, %v4117_v46 }
 0x8e1   : > { %v2241_v8 = vsel %vm1330_vm9, %v1518_v5, %v2221_v25  ;;  %v2410_v5 = vld [vmem:[%s3903_s29 + $0x50] sm:$0xff]  ;;  %v2409_v25 = vld [vmem:[%s3903_s29 + $0x48] sm:$0xff] }
 0x8ea   : > { %v2227_v63 = vpop.permute.xlu0 %2226  ;;  %v2235_v0 = vpop.permute.xlu2 %2234 }
 0x8eb   : > { %v2243_v10 = vsel %vm2242_vm10, %v2240_v62, %v2227_v63 }
 0x8ec   : > { %v2246_v4 = vsel %vm2245_vm11, %v2243_v10, %v2235_v0  ;;  %v2412_v10 = vld [vmem:[%s3903_s29 + $0x60] sm:$0xff] }
 0x8ed   : > { %2886 = vmatmul.msk.f32.vlgmr.msra.gmra.mxu1 %vm1166_vm1, %v2246_v4  ;;  %2419 = vmatpush.msrb.mxu3 %v2412_v10  ;;  %v2411_v4 = vld [vmem:[%s3903_s29 + $0x58] sm:$0xff] }
 0x8ef   : > { %2420 = vmatpush.msrb.mxu3 %v2411_v4 }
 0x8f1   : > { %2421 = vmatpush.msrb.mxu3 %v2410_v5 }
 0x8f2   : > { %v2229_v16 = vpop.permute.xlu0 %2228 }
 0x8f3   : > { %v2244_v9 = vsel %vm2242_vm10, %v2241_v8, %v2229_v16  ;;  %2422 = vmatpush.msrb.mxu3 %v2409_v25  ;;  %v2408_v16 = vld [vmem:[%s3903_s29 + $0x40] sm:$0xff]  ;;  %v2407_v8 = vld [vmem:[%s3903_s29 + $0x38] sm:$0xff] }
 0x8f5   : > { %2423 = vmatpush.msrb.mxu3 %v2408_v16 }
 0x8f7   : > { %2424 = vmatpush.msrb.mxu3 %v2407_v8 }
 0x94d   : > { %v2237_v53 = vpop.permute.xlu1 %2236 }
 0x94e   : > { %v2247_v11 = vsel %vm2245_vm11, %v2244_v9, %v2237_v53  ;;  %v2406_v9 = vld [vmem:[%s3903_s29 + $0x30] sm:$0xff]  ;;  %v2405_v53 = vld [vmem:[%s3903_s29 + $0x28] sm:$0xff] }
 0x94f   : > { %2887 = vmatmul.msk.f32.gmra.mxu1 %vm1166_vm1, %v2247_v11  ;;  %2425 = vmatpush.msrb.mxu3 %v2406_v9  ;;  %v2404_v11 = vld [vmem:[%s3903_s29 + $0x20] sm:$0xff] }
 0x951   : > { %2426 = vmatpush.msrb.mxu3 %v2405_v53 }
 0x953   : > { %2427 = vmatpush.msrb.mxu3 %v2404_v11 }
 0x96a   : > { %v2275_v18 = vpop.f32.mrf.mxu1 }
 0x96b   : > { %v2281_v19 = vadd.f32 %v2275_v18, %v3917_v3  ;;  %v2402_v18 = vld [vmem:[%s3903_s29 + $0x10] sm:$0xff] }
 0x96d   : > { %v4220_v20 = vadd.f32 %v3045_v13, %v2281_v19  ;;  %v2401_v19 = vld [vmem:[%s3903_s29 + $0x8] sm:$0xff] }
 0x96f   : > { %v2291_v21 = vsel %vm1166_vm1, %v4220_v20, 0.0 }
 0x970   : > { %2292 = vadd.xlane.f32.xlu0 %v2291_v21  ;;  %v2400_v21 = vld [vmem:[%s3903_s29] sm:$0xff] }
 0x9cc   : > { %v2278_v46 = vpop.f32.mrf.mxu1 }
 0x9cd   : > { %v2282_v22 = vadd.f32 %v2278_v46, %v3915_v2  ;;  %v3048_v46 = vld [vmem:[%s986_s0] ss:$0 sm:$0xff] }
 0x9cf   : > { %v4225_v23 = vadd.f32 %v3045_v13, %v2282_v22  ;;  %v2403_v13 = vld [vmem:[%s3903_s29 + $0x18] sm:$0xff] }
 0x9d0   : > { %2428 = vmatpush.msrb.mxu3 %v2403_v13 }
 0x9d1   : > { %v2294_v17 = vsel %vm1166_vm1, %v4225_v23, 0.0 }
 0x9d2   : > { %2295 = vadd.xlane.f32.xlu1 %v2294_v17  ;;  %2429 = vmatpush.msrb.mxu3 %v2402_v18 }
 0x9d4   : > { %2430 = vmatpush.msrb.mxu3 %v2401_v19 }
 0x9d6   : > { %2431 = vmatpush.msrb.mxu3 %v2400_v21 }
 0x9e3   : > { %v2293_v24 = vpop.xlane.xlu0 %2292 }
 0x9e4   : > { %v2297_v3 = vmul.f32 %v2293_v24, %v3923_v12 }
 0x9e6   : > { %v2299_v26 = vsub.f32 %v4220_v20, %v2297_v3 }
 0x9e8   : > { %v2301_v27 = vmul.f32 %v2299_v26, %v2299_v26 }
 0x9ea   : > { %v2303_v30 = vsel %vm1166_vm1, %v2301_v27, 0.0 }
 0x9eb   : > { %2304 = vadd.xlane.f32.xlu2 %v2303_v30 }
 0xa45   : > { %v2296_v2 = vpop.xlane.xlu1 %2295 }
 0xa46   : > { %v2298_v32 = vmul.f32 %v2296_v2, %v3923_v12 }
 0xa48   : > { %v2300_v33 = vsub.f32 %v4225_v23, %v2298_v32 }
 0xa4a   : > { %v2302_v34 = vmul.f32 %v2300_v33, %v2300_v33 }
 0xa4c   : > { %v2306_v35 = vsel %vm1166_vm1, %v2302_v34, 0.0 }
 0xa4d   : > { %2307 = vadd.xlane.f32.xlu0 %v2306_v35 }
 0xa5e   : > { %v2305_v39 = vpop.xlane.xlu2 %2304 }
 0xa5f   : > { %v2309_v40 = vmul.f32 %v2305_v39, %v3923_v12 }
 0xa61   : > { %v2311_v41 = vadd.f32 1e-05, %v2309_v40 }
 0xa63   : > { %3088 = vrsqrt.f32 %v2311_v41  ;;  %vm2319_vm13 = vweird.f32 %v2311_v41 }
 0xa69   : > { %v3089_v28 = vpop.eup %3088 }
 0xa6a   : > { %v2314_v42 = vmul.f32 %v3089_v28, %v2311_v41  ;;  %vm2320_vm12 = vweird.f32 %v3089_v28 }
 0xa6b   : > { %vm2321_vm14 = vmor %vm2319_vm13, %vm2320_vm12 }
 0xa6c   : > { %v2315_v43 = vmul.f32 %v3089_v28, %v2314_v42 }
 0xa6e   : > { %v2316_v44 = vmul.f32 0.5, %v2315_v43 }
 0xa70   : > { %v2317_v29 = vsub.f32 1.5, %v2316_v44  ;;  %v3049_v44 = vld [vmem:[%s995_s20] ss:$0 sm:$0xff] }
 0xa72   : > { %v2318_v45 = vmul.f32 %v3089_v28, %v2317_v29 }
 0xa74   : > { %v2322_v49 = vsel %vm2321_vm14, %v3089_v28, %v2318_v45 }
 0xa75   : > { %v2333_v31 = vmul.f32 %v2322_v49, %v2299_v26 }
 0xa77   : > { %v2338_v51 = vmul.f32 %v3046_v47, %v2333_v31 }
 0xa79   : > { %v2343_v7 = vadd.f32 %v3047_v50, %v2338_v51 }
 0xa7b   : > { %2888 = vmatmul.msk.f32.vlgmr.msrb.gmra.mxu2 %vm1166_vm1, %v2343_v7 }
 0xac0   : > { %v2308_v55 = vpop.xlane.xlu0 %2307 }
 0xac1   : > { %v2310_v56 = vmul.f32 %v2308_v55, %v3923_v12 }
 0xac3   : > { %v2312_v57 = vadd.f32 1e-05, %v2310_v56 }
 0xac5   : > { %3090 = vrsqrt.f32 %v2312_v57  ;;  %vm2329_vm0 = vweird.f32 %v2312_v57 }
 0xacb   : > { %v3091_v15 = vpop.eup %3090 }
 0xacc   : > { %v2324_v58 = vmul.f32 %v3091_v15, %v2312_v57  ;;  %vm2330_vm15 = vweird.f32 %v3091_v15 }
 0xacd   : > { %vm2331_vm2 = vmor %vm2329_vm0, %vm2330_vm15 }
 0xace   : > { %v2325_v59 = vmul.f32 %v3091_v15, %v2324_v58 }
 0xad0   : > { %v2326_v14 = vmul.f32 0.5, %v2325_v59 }
 0xad2   : > { %v2327_v60 = vsub.f32 1.5, %v2326_v14 }
 0xad4   : > { %v2328_v61 = vmul.f32 %v3091_v15, %v2327_v60 }
 0xad6   : > { %v2332_v62 = vsel %vm2331_vm2, %v3091_v15, %v2328_v61 }
 0xad7   : > { %v2334_v63 = vmul.f32 %v2332_v62, %v2300_v33 }
 0xad9   : > { %v2339_v0 = vmul.f32 %v3046_v47, %v2334_v63 }
 0xadb   : > { %v2344_v1 = vadd.f32 %v3047_v50, %v2339_v0 }
 0xadd   : > { %2889 = vmatmul.msk.f32.gmra.mxu2 %vm1166_vm1, %v2344_v1 }
 0xafe   : > { %v2376_v22 = vpop.f32.mrf.mxu2 }
 0xaff   : > { %v2377_v17 = vadd.f32 %v3048_v46, %v2376_v22 }
 0xb01   : > { %v2382_v24 = vmul.f32 %v2377_v17, %v2377_v17 }
 0xb03   : > { %v2384_v3 = vmul.f32 %v2382_v24, %v2377_v17 }
 0xb05   : > { %v2386_v26 = vmul.f32 0.044715, %v2384_v3 }
 0xb07   : > { %v2388_v27 = vadd.f32 %v2386_v26, %v2377_v17 }
 0xb09   : > { %v2390_v30 = vmul.f32 0.7978846, %v2388_v27 }
 0xb0b   : > { %3092 = vtanh.f32 %v2390_v30 }
 0xb11   : > { %v3093_v2 = vpop.eup %3092 }
 0xb12   : > { %v2394_v32 = vadd.f32 1.0, %v3093_v2 }
 0xb14   : > { %v2396_v33 = vmul.f32 0.5, %v2394_v32 }
 0xb16   : > { %v2398_v34 = vmul.f32 %v2396_v33, %v2377_v17 }
 0xb18   : > { %2432 = vmatmul.f32.vlgmr.msrb.gmra.mxu3 %v2398_v34 }
 0xb60   : > { %v2379_v35 = vpop.f32.mrf.mxu2 }
 0xb61   : > { %v2380_v48 = vadd.f32 %v3048_v46, %v2379_v35 }
 0xb63   : > { %v2383_v36 = vmul.f32 %v2380_v48, %v2380_v48 }
 0xb65   : > { %v2385_v37 = vmul.f32 %v2383_v36, %v2380_v48 }
 0xb67   : > { %v2387_v38 = vmul.f32 0.044715, %v2385_v37 }
 0xb69   : > { %v2389_v39 = vadd.f32 %v2387_v38, %v2380_v48 }
 0xb6b   : > { %v2391_v40 = vmul.f32 0.7978846, %v2389_v39 }
 0xb6d   : > { %3094 = vtanh.f32 %v2391_v40 }
 0xb73   : > { %v3095_v41 = vpop.eup %3094 }
 0xb74   : > { %v2395_v28 = vadd.f32 1.0, %v3095_v41 }
 0xb76   : > { %v2397_v42 = vmul.f32 0.5, %v2395_v28 }
 0xb78   : > { %v2399_v43 = vmul.f32 %v2397_v42, %v2380_v48 }
 0xb7a   : > { %2435 = vmatmul.f32.gmra.mxu3 %v2399_v43 }
 0xb9b   : > { %v2433_v29 = vpop.f32.mrf.mxu3 }
 0xb9c   : > { %v2439_v45 = vadd.f32 %v2433_v29, %v4220_v20 }
 0xb9e   : > { %v2445_v47 = vadd.f32 %v3049_v44, %v2439_v45 }
 0xba0   : > { %2447 = vst.msk [vmem:[#allocation2] sm:$0xff] %vm1166_vm1, %v2445_v47 }
 0xbfd   : > { %v2436_v49 = vpop.f32.mrf.mxu3 }
 0xbfe   : > { %v2440_v31 = vadd.f32 %v2436_v49, %v4225_v23  ;;  %2452 = sbr.rel (%p2890_p3) target bundleno = 3352 (0xd18), region = 164 }
 0xc00   : > { %v2446_v50 = vadd.f32 %v3049_v44, %v2440_v31 }
 0xc02   : > { %2448 = vst.msk [vmem:[#allocation2 + $0x8] sm:$0xff] %vm1166_vm1, %v2446_v50 }
 0xc03   : > { %v2455_v51 = vsel %vm1166_vm1, %v2445_v47, 0.0  ;;  %v2458_v7 = vsel %vm1166_vm1, %v2446_v50, 0.0  ;;  %v3096_v9 = vld [vmem:[%s4388_s30] ss:$0 sm:$0xff] }
 0xc04   : > { %2456 = vadd.xlane.f32.xlu0 %v2455_v51  ;;  %v3097_v13 = vld [vmem:[%s4389_s24] ss:$0 sm:$0xff] }
 0xc0c   : > { %2459 = vadd.xlane.f32.xlu0 %v2458_v7 }
 0xc77   : > { %v2457_v52 = vpop.xlane.xlu0 %2456 }
 0xc78   : > { %v2461_v20 = vmul.f32 %v2457_v52, %v3923_v12 }
 0xc7a   : > { %v2463_v6 = vsub.f32 %v2445_v47, %v2461_v20 }
 0xc7c   : > { %v2465_v54 = vmul.f32 %v2463_v6, %v2463_v6 }
 0xc7e   : > { %v2467_v55 = vsel %vm1166_vm1, %v2465_v54, 0.0 }
 0xc7f   : > { %2468 = vadd.xlane.f32.xlu1 %v2467_v55  ;;  %v2460_v23 = vpop.xlane.xlu0 %2459 }
 0xc80   : > { %v2462_v56 = vmul.f32 %v2460_v23, %v3923_v12 }
 0xc82   : > { %v2464_v57 = vsub.f32 %v2446_v50, %v2462_v56 }
 0xc84   : > { %v2466_v15 = vmul.f32 %v2464_v57, %v2464_v57 }
 0xc86   : > { %v2470_v58 = vsel %vm1166_vm1, %v2466_v15, 0.0 }
 0xc87   : > { %2471 = vadd.xlane.f32.xlu1 %v2470_v58 }
 0xcf2   : > { %v2469_v59 = vpop.xlane.xlu1 %2468 }
 0xcf3   : > { %v2473_v14 = vmul.f32 %v2469_v59, %v3923_v12 }
 0xcf5   : > { %v2475_v60 = vadd.f32 1e-05, %v2473_v14 }
 0xcf7   : > { %3098 = vrsqrt.f32 %v2475_v60  ;;  %vm2483_vm4 = vweird.f32 %v2475_v60 }
 0xcfa   : > { %v2472_v61 = vpop.xlane.xlu1 %2471 }
 0xcfb   : > { %v2474_v62 = vmul.f32 %v2472_v61, %v3923_v12 }
 0xcfd   : > { %v3099_v63 = vpop.eup %3098  ;;  %v2476_v0 = vadd.f32 1e-05, %v2474_v62 }
 0xcfe   : > { %v2478_v1 = vmul.f32 %v3099_v63, %v2475_v60  ;;  %vm2484_vm3 = vweird.f32 %v3099_v63 }
 0xcff   : > { %3100 = vrsqrt.f32 %v2476_v0  ;;  %vm2485_vm5 = vmor %vm2483_vm4, %vm2484_vm3  ;;  %vm2493_vm7 = vweird.f32 %v2476_v0 }
 0xd00   : > { %v2479_v10 = vmul.f32 %v3099_v63, %v2478_v1 }
 0xd02   : > { %v2480_v4 = vmul.f32 0.5, %v2479_v10 }
 0xd04   : > { %v2481_v5 = vsub.f32 1.5, %v2480_v4 }
 0xd05   : > { %v3101_v25 = vpop.eup %3100 }
 0xd06   : > { %v2482_v16 = vmul.f32 %v3099_v63, %v2481_v5  ;;  %v2488_v8 = vmul.f32 %v3101_v25, %v2476_v0  ;;  %vm2494_vm6 = vweird.f32 %v3101_v25 }
 0xd07   : > { %vm2495_vm8 = vmor %vm2493_vm7, %vm2494_vm6 }
 0xd08   : > { %v2486_v53 = vsel %vm2485_vm5, %v3099_v63, %v2482_v16  ;;  %v2489_v11 = vmul.f32 %v3101_v25, %v2488_v8 }
 0xd09   : > { %v2497_v12 = vmul.f32 %v2486_v53, %v2463_v6 }
 0xd0a   : > { %v2490_v18 = vmul.f32 0.5, %v2489_v11 }
 0xd0b   : > { %v2502_v19 = vmul.f32 %v3096_v9, %v2497_v12 }
 0xd0c   : > { %v2491_v21 = vsub.f32 1.5, %v2490_v18 }
 0xd0d   : > { %v2507_v46 = vadd.f32 %v3097_v13, %v2502_v19 }
 0xd0e   : > { %v2492_v22 = vmul.f32 %v3101_v25, %v2491_v21 }
 0xd0f   : > { %2509 = vst.msk [vmem:[#allocation18] sm:$0xff] %vm1166_vm1, %v2507_v46 }
 0xd10   : > { %v2496_v17 = vsel %vm2495_vm8, %v3101_v25, %v2492_v22 }
 0xd11   : > { %v2498_v24 = vmul.f32 %v2496_v17, %v2464_v57 }
 0xd13   : > { %v2503_v3 = vmul.f32 %v3096_v9, %v2498_v24 }
 0xd15   : > { %v2508_v26 = vadd.f32 %v3097_v13, %v2503_v3 }
 0xd17   : > { %2510 = vst.msk [vmem:[#allocation18 + $0x8] sm:$0xff] %vm1166_vm1, %v2508_v26 }
 0xd18 PF: > { %p2977_p4 = scmp.eq.s32.totalorder %s3711_s23, 1  ;;  %s4390_s0 = sld [smem:[#allocation47_spill]] }
 0xd19   : > { %s3565_s8 = smov [#allocation18]   ;;  %s3566_s5 = smov 128  }
 0xd1a   : > { %s2519_s13 = sshll.u32 %s3565_s8, 4  ;;  %s2520_s13 = int_to_ptr.vmem [resolvable:$true] %s2519_s13 }
 0xd1e   : > { %s2521_s20 = sshll.u32 %s4390_s0, 4  ;;  %s2522_s20 = int_to_ptr.hbm [resolvable:$true] %s2521_s20 }
 0xd1f   : > { %2931 = dma.vmem_to_hbm [thread:$0]  (%p2977_p4), %s2520_s13, 256, %s2522_s20, [#allocation5], %s3566_s5, %s3566_s5, %s3560_s1  }
 0xd20   : > { %3527 = dma.done.wait (%p2977_p4), [#allocation5], 256  }
 0xd21   : > { %3529 = vsyncadd (%p2977_p4), [#allocation5], 4294967040 }
 0xd22 PF: > { %s4391_s25 = sld [smem:[#allocation24_spill]]  ;;  %s4395_s3 = smov %s3536_s28 }
 0xd23   : > { %s4392_s16 = sld [smem:[#allocation23_spill]]  ;;  %s4397_s30 = smov %s3548_s4 }
 0xd24   : > { %s4393_s29 = sld [smem:[#allocation26_spill]] }
 0xd25   : > { %s4394_s23 = sld [smem:[#allocation25_spill]] }
 0xd28   : > { %s35_s0 = sadd.s32 1, %s4391_s25  }
 0xd29   : > { %p32_p5 = scmp.ge.s32.totalorder %s35_s0, 4   ;;  %s4396_s28 = smov %s4392_s16 }
 0xd2b   : > { %s4398_s4 = smov %s4394_s23  ;;  %34 = sbr.rel (!%p32_p5) target bundleno = 27 (0x1b), region = 279 }
 0xd30   :  { %2538 = vsyncpa [#allocation4], 1 }
 0xd31   :  { %2540 = vsyncpa [#allocation4 + $0x1], 1 }
 0xd32   :  { %2541 = vsyncpa [#allocation7], 1 }
 0xd33   :  { %2542 = vsyncpa [#allocation5], 1 }
 0xd34   :  { %2544 = vsyncpa [#allocation5 + $0x1], 1 }

</bundles_post_ra>
